<compile_context>
chip_gen: v5e
topology: v5e:2x2
jax: 0.10.0
libtpu: 0.0.40
codegen_flags: <defaults>
</compile_context>

<pallas_src>
import math
from functools import partial

import jax
import jax.numpy as jnp
from jax import lax
from jax.experimental import pallas as pl
from jax.experimental.pallas import tpu as pltpu


def _layer_norm(x, gamma, beta, eps):
    mu = jnp.mean(x, axis=-1, keepdims=True)
    var = jnp.mean((x - mu) * (x - mu), axis=-1, keepdims=True)
    return (x - mu) * lax.rsqrt(var + eps) * gamma + beta


def _encoder_layer_kernel(x_ref, mask_ref,
                          wq_ref, wk_ref, wv_ref, wo_ref,
                          ln1_g_ref, ln1_b_ref,
                          w1_ref, b1_ref, w2_ref, b2_ref,
                          ln2_g_ref, ln2_b_ref,
                          out_ref, *, n_head, d_k, eps):
    x = x_ref[0].astype(jnp.float32)          # (S, D)
    key_pad = mask_ref[0] != 0                # (1, S)  True where key is padding

    inv_sqrt_dk = 1.0 / math.sqrt(d_k)

    # ---- Multi-head self-attention (heads statically unrolled) ----
    attn_out = jnp.zeros_like(x)              # (S, D)
    for h in range(n_head):
        qh = jnp.dot(x, wq_ref[h], preferred_element_type=jnp.float32)   # (S, dk)
        kh = jnp.dot(x, wk_ref[h], preferred_element_type=jnp.float32)   # (S, dk)
        vh = jnp.dot(x, wv_ref[h], preferred_element_type=jnp.float32)   # (S, dk)
        # scores = qh @ kh^T / sqrt(dk)  (contract last dims, no explicit transpose)
        s = lax.dot_general(qh, kh, (((1,), (1,)), ((), ())),
                            preferred_element_type=jnp.float32) * inv_sqrt_dk
        s = jnp.where(key_pad, -1e9, s)        # masked_fill over key positions
        p = jax.nn.softmax(s, axis=-1)
        # TODO(synk): attention dropout is eval-mode identity (no in-kernel RNG).
        ch = jnp.dot(p, vh, preferred_element_type=jnp.float32)          # (S, dk)
        # accumulate head contribution of the output projection
        attn_out = attn_out + jnp.dot(ch, wo_ref[h],
                                      preferred_element_type=jnp.float32)

    h1 = _layer_norm(attn_out + x, ln1_g_ref[...], ln1_b_ref[...], eps)   # (S, D)

    # ---- Position-wise feed-forward ----
    ff = jnp.dot(h1, w1_ref[...], preferred_element_type=jnp.float32) + b1_ref[...]
    ff = jnp.maximum(ff, 0.0)
    ff = jnp.dot(ff, w2_ref[...], preferred_element_type=jnp.float32) + b2_ref[...]
    # TODO(synk): FFN dropout is eval-mode identity (no in-kernel RNG).
    out = _layer_norm(ff + h1, ln2_g_ref[...], ln2_b_ref[...], eps)

    out_ref[0] = out.astype(out_ref.dtype)


def encoder_layer_forward(x, mask, params, *, n_head, eps=1e-5):
    """Pallas equivalent of PyTorch EncoderLayer.forward(x, mask) (eval mode).

    x:    (B, S, D) float32
    mask: (B, 1, S) int/bool, nonzero where the key position is padding
    """
    B, S, D = x.shape
    assert D % n_head == 0
    d_k = D // n_head
    d_ff = params["w1"].shape[1]

    # Pre-split projection weights per head (host side, negligible cost):
    #   q_head_h = x @ wq[:, h*dk:(h+1)*dk]  ->  (H, D, dk) slabs
    #   out      = sum_h ctx_h @ wo[h*dk:(h+1)*dk, :]  -> (H, dk, D) slabs
    wq = params["wq"].reshape(D, n_head, d_k).transpose(1, 0, 2)
    wk = params["wk"].reshape(D, n_head, d_k).transpose(1, 0, 2)
    wv = params["wv"].reshape(D, n_head, d_k).transpose(1, 0, 2)
    wo = params["wo"].reshape(n_head, d_k, D)

    mask_i32 = mask.astype(jnp.int32)

    kernel = partial(_encoder_layer_kernel, n_head=n_head, d_k=d_k, eps=eps)

    const2 = lambda b: (0, 0)
    const3 = lambda b: (0, 0, 0)

    return pl.pallas_call(
        kernel,
        out_shape=jax.ShapeDtypeStruct((B, S, D), x.dtype),
        grid=(B,),
        in_specs=[
            pl.BlockSpec((1, S, D), lambda b: (b, 0, 0)),          # x
            pl.BlockSpec((1, 1, S), lambda b: (b, 0, 0)),          # mask
            pl.BlockSpec((n_head, D, d_k), const3),                # wq (per head)
            pl.BlockSpec((n_head, D, d_k), const3),                # wk
            pl.BlockSpec((n_head, D, d_k), const3),                # wv
            pl.BlockSpec((n_head, d_k, D), const3),                # wo
            pl.BlockSpec((1, D), const2),                          # ln1 gamma
            pl.BlockSpec((1, D), const2),                          # ln1 beta
            pl.BlockSpec((D, d_ff), const2),                       # w1
            pl.BlockSpec((1, d_ff), const2),                       # b1
            pl.BlockSpec((d_ff, D), const2),                       # w2
            pl.BlockSpec((1, D), const2),                          # b2
            pl.BlockSpec((1, D), const2),                          # ln2 gamma
            pl.BlockSpec((1, D), const2),                          # ln2 beta
        ],
        out_specs=pl.BlockSpec((1, S, D), lambda b: (b, 0, 0)),
        compiler_params=pltpu.CompilerParams(
            dimension_semantics=("parallel",),   # batch steps are independent
        ),
    )(x, mask_i32, wq, wk, wv, wo,
      params["ln1_g"], params["ln1_b"],
      params["w1"], params["b1"], params["w2"], params["b2"],
      params["ln2_g"], params["ln2_b"])


# ----------------------- pure-JAX reference (PyTorch semantics) ---------------
def encoder_layer_ref(x, mask, params, *, n_head, eps=1e-5):
    B, S, D = x.shape
    d_k = D // n_head

    def split_heads(t):
        return t.reshape(B, S, n_head, d_k).transpose(0, 2, 1, 3)   # (B,H,S,dk)

    q = split_heads(x @ params["wq"])
    k = split_heads(x @ params["wk"])
    v = split_heads(x @ params["wv"])
    scores = jnp.einsum("bhqd,bhkd->bhqk", q, k) / math.sqrt(d_k)
    scores = jnp.where(mask[:, :, None, :] != 0, -1e9, scores)
    p = jax.nn.softmax(scores, axis=-1)
    ctx = jnp.einsum("bhqk,bhkd->bhqd", p, v)
    ctx = ctx.transpose(0, 2, 1, 3).reshape(B, S, D)
    attn = ctx @ params["wo"]
    h1 = _layer_norm(attn + x, params["ln1_g"], params["ln1_b"], eps)
    ff = jnp.maximum(h1 @ params["w1"] + params["b1"], 0.0)
    ff = ff @ params["w2"] + params["b2"]
    return _layer_norm(ff + h1, params["ln2_g"], params["ln2_b"], eps)


if __name__ == "__main__":
    # Small, TPU-friendly shapes consistent with the module
    # (lane-dense d_model, sublane-dense seq).
    d_model, n_head, d_ff = 128, 4, 256
    B, S = 2, 16

    key = jax.random.PRNGKey(0)
    ks = jax.random.split(key, 8)
    init = lambda k, shape, scale: jax.random.normal(k, shape, jnp.float32) * scale

    params = {
        "wq": init(ks[0], (d_model, d_model), 1.0 / math.sqrt(d_model)),
        "wk": init(ks[1], (d_model, d_model), 1.0 / math.sqrt(d_model)),
        "wv": init(ks[2], (d_model, d_model), 1.0 / math.sqrt(d_model)),
        "wo": init(ks[3], (d_model, d_model), 1.0 / math.sqrt(d_model)),
        "ln1_g": jnp.ones((1, d_model), jnp.float32),
        "ln1_b": jnp.zeros((1, d_model), jnp.float32),
        "w1": init(ks[4], (d_model, d_ff), 1.0 / math.sqrt(d_model)),
        "b1": jnp.zeros((1, d_ff), jnp.float32),
        "w2": init(ks[5], (d_ff, d_model), 1.0 / math.sqrt(d_ff)),
        "b2": jnp.zeros((1, d_model), jnp.float32),
        "ln2_g": jnp.ones((1, d_model), jnp.float32),
        "ln2_b": jnp.zeros((1, d_model), jnp.float32),
    }

    x = init(ks[6], (B, S, d_model), 1.0)

    # Padding mask (like get_padding_mask): sequence 0 full length,
    # sequence 1 has its last 6 positions padded.  Shape (B, 1, S), 1 = pad.
    lengths = jnp.array([S, S - 6], jnp.int32)
    pos = jnp.arange(S)[None, :]
    mask = (pos >= lengths[:, None]).astype(jnp.int32)[:, None, :]

    out = encoder_layer_forward(x, mask, params, n_head=n_head)
    out = jax.block_until_ready(out)

    ref = encoder_layer_ref(x, mask, params, n_head=n_head)
    assert out.shape == (B, S, d_model)
    assert out.dtype == jnp.float32
    assert jnp.allclose(out, ref, atol=1e-2, rtol=1e-2), float(
        jnp.max(jnp.abs(out - ref)))

    print("KERNEL_OK")
</pallas_src>

<mosaic_0001>
module attributes {stable_mosaic.version = 11 : i64} {
  func.func @_encoder_layer_kernel(%arg0: i32, %arg1: memref<1x16x128xf32, #tpu.memory_space<vmem>>, %arg2: memref<1x1x16xi32, #tpu.memory_space<vmem>>, %arg3: memref<4x128x32xf32, #tpu.memory_space<vmem>>, %arg4: memref<4x128x32xf32, #tpu.memory_space<vmem>>, %arg5: memref<4x128x32xf32, #tpu.memory_space<vmem>>, %arg6: memref<4x32x128xf32, #tpu.memory_space<vmem>>, %arg7: memref<1x128xf32, #tpu.memory_space<vmem>>, %arg8: memref<1x128xf32, #tpu.memory_space<vmem>>, %arg9: memref<128x256xf32, #tpu.memory_space<vmem>>, %arg10: memref<1x256xf32, #tpu.memory_space<vmem>>, %arg11: memref<256x128xf32, #tpu.memory_space<vmem>>, %arg12: memref<1x128xf32, #tpu.memory_space<vmem>>, %arg13: memref<1x128xf32, #tpu.memory_space<vmem>>, %arg14: memref<1x128xf32, #tpu.memory_space<vmem>>, %arg15: memref<1x16x128xf32, #tpu.memory_space<vmem>>) attributes {dimension_semantics = [#tpu.dimension_semantics<parallel>], iteration_bounds = array<i64: 2>, scalar_prefetch = 0 : i64, scratch_operands = 0 : i64, tpu.core_type = #tpu.core_type<tc>, window_params = [{transform_indices = @transform_0, window_bounds = array<i64: 1, 16, 128>}, {transform_indices = @transform_1, window_bounds = array<i64: 1, 1, 16>}, {pipeline_mode = #tpu.pipeline_mode<synchronous>, transform_indices = @transform_2, window_bounds = array<i64: 4, 128, 32>}, {pipeline_mode = #tpu.pipeline_mode<synchronous>, transform_indices = @transform_3, window_bounds = array<i64: 4, 128, 32>}, {pipeline_mode = #tpu.pipeline_mode<synchronous>, transform_indices = @transform_4, window_bounds = array<i64: 4, 128, 32>}, {pipeline_mode = #tpu.pipeline_mode<synchronous>, transform_indices = @transform_5, window_bounds = array<i64: 4, 32, 128>}, {pipeline_mode = #tpu.pipeline_mode<synchronous>, transform_indices = @transform_6, window_bounds = array<i64: 1, 128>}, {pipeline_mode = #tpu.pipeline_mode<synchronous>, transform_indices = @transform_7, window_bounds = array<i64: 1, 128>}, {pipeline_mode = #tpu.pipeline_mode<synchronous>, transform_indices = @transform_8, window_bounds = array<i64: 128, 256>}, {pipeline_mode = #tpu.pipeline_mode<synchronous>, transform_indices = @transform_9, window_bounds = array<i64: 1, 256>}, {pipeline_mode = #tpu.pipeline_mode<synchronous>, transform_indices = @transform_10, window_bounds = array<i64: 256, 128>}, {pipeline_mode = #tpu.pipeline_mode<synchronous>, transform_indices = @transform_11, window_bounds = array<i64: 1, 128>}, {pipeline_mode = #tpu.pipeline_mode<synchronous>, transform_indices = @transform_12, window_bounds = array<i64: 1, 128>}, {pipeline_mode = #tpu.pipeline_mode<synchronous>, transform_indices = @transform_13, window_bounds = array<i64: 1, 128>}, {transform_indices = @transform_14, window_bounds = array<i64: 1, 16, 128>}]} {
    %c0 = arith.constant 0 : index
    %c0_0 = arith.constant 0 : index
    %c0_1 = arith.constant 0 : index
    %0 = vector.load %arg1[%c0, %c0_0, %c0_1] : memref<1x16x128xf32, #tpu.memory_space<vmem>>, vector<1x16x128xf32>
    %1 = vector.shape_cast %0 : vector<1x16x128xf32> to vector<16x128xf32>
    %c0_2 = arith.constant 0 : index
    %c0_3 = arith.constant 0 : index
    %c0_4 = arith.constant 0 : index
    %2 = vector.load %arg2[%c0_2, %c0_3, %c0_4] : memref<1x1x16xi32, #tpu.memory_space<vmem>>, vector<1x1x16xi32>
    %3 = vector.shape_cast %2 : vector<1x1x16xi32> to vector<1x16xi32>
    %c0_i32 = arith.constant 0 : i32
    %4 = vector.broadcast %c0_i32 : i32 to vector<1x16xi32>
    %5 = arith.cmpi ne, %3, %4 : vector<1x16xi32>
    %cst = arith.constant 0.000000e+00 : f32
    %6 = vector.broadcast %cst : f32 to vector<16x128xf32>
    %c0_5 = arith.constant 0 : index
    %c0_6 = arith.constant 0 : index
    %c0_7 = arith.constant 0 : index
    %7 = vector.load %arg3[%c0_5, %c0_6, %c0_7] : memref<4x128x32xf32, #tpu.memory_space<vmem>>, vector<1x128x32xf32>
    %8 = vector.shape_cast %7 : vector<1x128x32xf32> to vector<128x32xf32>
    %cst_8 = arith.constant dense<0.000000e+00> : vector<16x32xf32>
    %9 = tpu.matmul %1, %8, %cst_8 {dimension_numbers = #tpu.dot_dimension_numbers<[1], [0], [0], [1], [0, 0, 1, 1], [], []>} : vector<16x128xf32>, vector<128x32xf32>, vector<16x32xf32> -> vector<16x32xf32>
    %c0_9 = arith.constant 0 : index
    %c0_10 = arith.constant 0 : index
    %c0_11 = arith.constant 0 : index
    %10 = vector.load %arg4[%c0_9, %c0_10, %c0_11] : memref<4x128x32xf32, #tpu.memory_space<vmem>>, vector<1x128x32xf32>
    %11 = vector.shape_cast %10 : vector<1x128x32xf32> to vector<128x32xf32>
    %cst_12 = arith.constant dense<0.000000e+00> : vector<16x32xf32>
    %12 = tpu.matmul %1, %11, %cst_12 {dimension_numbers = #tpu.dot_dimension_numbers<[1], [0], [0], [1], [0, 0, 1, 1], [], []>} : vector<16x128xf32>, vector<128x32xf32>, vector<16x32xf32> -> vector<16x32xf32>
    %c0_13 = arith.constant 0 : index
    %c0_14 = arith.constant 0 : index
    %c0_15 = arith.constant 0 : index
    %13 = vector.load %arg5[%c0_13, %c0_14, %c0_15] : memref<4x128x32xf32, #tpu.memory_space<vmem>>, vector<1x128x32xf32>
    %14 = vector.shape_cast %13 : vector<1x128x32xf32> to vector<128x32xf32>
    %cst_16 = arith.constant dense<0.000000e+00> : vector<16x32xf32>
    %15 = tpu.matmul %1, %14, %cst_16 {dimension_numbers = #tpu.dot_dimension_numbers<[1], [0], [0], [1], [0, 0, 1, 1], [], []>} : vector<16x128xf32>, vector<128x32xf32>, vector<16x32xf32> -> vector<16x32xf32>
    %cst_17 = arith.constant dense<0.000000e+00> : vector<16x16xf32>
    %16 = tpu.matmul %9, %12, %cst_17 {dimension_numbers = #tpu.dot_dimension_numbers<[1], [1], [0], [0], [0, 0, 1, 0], [], []>} : vector<16x32xf32>, vector<16x32xf32>, vector<16x16xf32> -> vector<16x16xf32>
    %cst_18 = arith.constant 0.176776692 : f32
    %17 = vector.broadcast %cst_18 : f32 to vector<16x16xf32>
    %18 = arith.mulf %16, %17 : vector<16x16xf32>
    %cst_19 = arith.constant -1.000000e+09 : f32
    %19 = vector.shape_cast %5 : vector<1x16xi1> to vector<1x16xi1>
    %20 = vector.broadcast %19 : vector<1x16xi1> to vector<16x16xi1>
    %21 = vector.broadcast %cst_19 : f32 to vector<16x16xf32>
    %22 = arith.select %20, %21, %18 : vector<16x16xi1>, vector<16x16xf32>
    %cst_20 = arith.constant dense<0xFF800000> : vector<16xf32>
    %23 = vector.multi_reduction <maximumf>, %22, %cst_20 [1] : vector<16x16xf32> to vector<16xf32>
    %cst_21 = arith.constant 0xFF800000 : f32
    %24 = vector.broadcast %cst_21 : f32 to vector<16xf32>
    %25 = arith.maximumf %24, %23 : vector<16xf32>
    %26 = vector.shape_cast %25 : vector<16xf32> to vector<16x1xf32>
    %27 = vector.broadcast %26 : vector<16x1xf32> to vector<16x16xf32>
    %28 = arith.subf %22, %27 : vector<16x16xf32>
    %29 = math.exp %28 : vector<16x16xf32>
    %cst_22 = arith.constant dense<0.000000e+00> : vector<16xf32>
    %30 = vector.multi_reduction <add>, %29, %cst_22 [1] : vector<16x16xf32> to vector<16xf32>
    %31 = vector.shape_cast %30 : vector<16xf32> to vector<16x1xf32>
    %32 = vector.broadcast %31 : vector<16x1xf32> to vector<16x16xf32>
    %33 = arith.divf %29, %32 : vector<16x16xf32>
    %cst_23 = arith.constant dense<0.000000e+00> : vector<16x32xf32>
    %34 = tpu.matmul %33, %15, %cst_23 {dimension_numbers = #tpu.dot_dimension_numbers<[1], [0], [0], [1], [0, 0, 1, 1], [], []>} : vector<16x16xf32>, vector<16x32xf32>, vector<16x32xf32> -> vector<16x32xf32>
    %c0_24 = arith.constant 0 : index
    %c0_25 = arith.constant 0 : index
    %c0_26 = arith.constant 0 : index
    %35 = vector.load %arg6[%c0_24, %c0_25, %c0_26] : memref<4x32x128xf32, #tpu.memory_space<vmem>>, vector<1x32x128xf32>
    %36 = vector.shape_cast %35 : vector<1x32x128xf32> to vector<32x128xf32>
    %cst_27 = arith.constant dense<0.000000e+00> : vector<16x128xf32>
    %37 = tpu.matmul %34, %36, %cst_27 {dimension_numbers = #tpu.dot_dimension_numbers<[1], [0], [0], [1], [0, 0, 1, 1], [], []>} : vector<16x32xf32>, vector<32x128xf32>, vector<16x128xf32> -> vector<16x128xf32>
    %38 = arith.addf %6, %37 : vector<16x128xf32>
    %c1 = arith.constant 1 : index
    %c0_28 = arith.constant 0 : index
    %c0_29 = arith.constant 0 : index
    %39 = vector.load %arg3[%c1, %c0_28, %c0_29] : memref<4x128x32xf32, #tpu.memory_space<vmem>>, vector<1x128x32xf32>
    %40 = vector.shape_cast %39 : vector<1x128x32xf32> to vector<128x32xf32>
    %cst_30 = arith.constant dense<0.000000e+00> : vector<16x32xf32>
    %41 = tpu.matmul %1, %40, %cst_30 {dimension_numbers = #tpu.dot_dimension_numbers<[1], [0], [0], [1], [0, 0, 1, 1], [], []>} : vector<16x128xf32>, vector<128x32xf32>, vector<16x32xf32> -> vector<16x32xf32>
    %c1_31 = arith.constant 1 : index
    %c0_32 = arith.constant 0 : index
    %c0_33 = arith.constant 0 : index
    %42 = vector.load %arg4[%c1_31, %c0_32, %c0_33] : memref<4x128x32xf32, #tpu.memory_space<vmem>>, vector<1x128x32xf32>
    %43 = vector.shape_cast %42 : vector<1x128x32xf32> to vector<128x32xf32>
    %cst_34 = arith.constant dense<0.000000e+00> : vector<16x32xf32>
    %44 = tpu.matmul %1, %43, %cst_34 {dimension_numbers = #tpu.dot_dimension_numbers<[1], [0], [0], [1], [0, 0, 1, 1], [], []>} : vector<16x128xf32>, vector<128x32xf32>, vector<16x32xf32> -> vector<16x32xf32>
    %c1_35 = arith.constant 1 : index
    %c0_36 = arith.constant 0 : index
    %c0_37 = arith.constant 0 : index
    %45 = vector.load %arg5[%c1_35, %c0_36, %c0_37] : memref<4x128x32xf32, #tpu.memory_space<vmem>>, vector<1x128x32xf32>
    %46 = vector.shape_cast %45 : vector<1x128x32xf32> to vector<128x32xf32>
    %cst_38 = arith.constant dense<0.000000e+00> : vector<16x32xf32>
    %47 = tpu.matmul %1, %46, %cst_38 {dimension_numbers = #tpu.dot_dimension_numbers<[1], [0], [0], [1], [0, 0, 1, 1], [], []>} : vector<16x128xf32>, vector<128x32xf32>, vector<16x32xf32> -> vector<16x32xf32>
    %cst_39 = arith.constant dense<0.000000e+00> : vector<16x16xf32>
    %48 = tpu.matmul %41, %44, %cst_39 {dimension_numbers = #tpu.dot_dimension_numbers<[1], [1], [0], [0], [0, 0, 1, 0], [], []>} : vector<16x32xf32>, vector<16x32xf32>, vector<16x16xf32> -> vector<16x16xf32>
    %cst_40 = arith.constant 0.176776692 : f32
    %49 = vector.broadcast %cst_40 : f32 to vector<16x16xf32>
    %50 = arith.mulf %48, %49 : vector<16x16xf32>
    %cst_41 = arith.constant -1.000000e+09 : f32
    %51 = vector.shape_cast %5 : vector<1x16xi1> to vector<1x16xi1>
    %52 = vector.broadcast %51 : vector<1x16xi1> to vector<16x16xi1>
    %53 = vector.broadcast %cst_41 : f32 to vector<16x16xf32>
    %54 = arith.select %52, %53, %50 : vector<16x16xi1>, vector<16x16xf32>
    %cst_42 = arith.constant dense<0xFF800000> : vector<16xf32>
    %55 = vector.multi_reduction <maximumf>, %54, %cst_42 [1] : vector<16x16xf32> to vector<16xf32>
    %cst_43 = arith.constant 0xFF800000 : f32
    %56 = vector.broadcast %cst_43 : f32 to vector<16xf32>
    %57 = arith.maximumf %56, %55 : vector<16xf32>
    %58 = vector.shape_cast %57 : vector<16xf32> to vector<16x1xf32>
    %59 = vector.broadcast %58 : vector<16x1xf32> to vector<16x16xf32>
    %60 = arith.subf %54, %59 : vector<16x16xf32>
    %61 = math.exp %60 : vector<16x16xf32>
    %cst_44 = arith.constant dense<0.000000e+00> : vector<16xf32>
    %62 = vector.multi_reduction <add>, %61, %cst_44 [1] : vector<16x16xf32> to vector<16xf32>
    %63 = vector.shape_cast %62 : vector<16xf32> to vector<16x1xf32>
    %64 = vector.broadcast %63 : vector<16x1xf32> to vector<16x16xf32>
    %65 = arith.divf %61, %64 : vector<16x16xf32>
    %cst_45 = arith.constant dense<0.000000e+00> : vector<16x32xf32>
    %66 = tpu.matmul %65, %47, %cst_45 {dimension_numbers = #tpu.dot_dimension_numbers<[1], [0], [0], [1], [0, 0, 1, 1], [], []>} : vector<16x16xf32>, vector<16x32xf32>, vector<16x32xf32> -> vector<16x32xf32>
    %c1_46 = arith.constant 1 : index
    %c0_47 = arith.constant 0 : index
    %c0_48 = arith.constant 0 : index
    %67 = vector.load %arg6[%c1_46, %c0_47, %c0_48] : memref<4x32x128xf32, #tpu.memory_space<vmem>>, vector<1x32x128xf32>
    %68 = vector.shape_cast %67 : vector<1x32x128xf32> to vector<32x128xf32>
    %cst_49 = arith.constant dense<0.000000e+00> : vector<16x128xf32>
    %69 = tpu.matmul %66, %68, %cst_49 {dimension_numbers = #tpu.dot_dimension_numbers<[1], [0], [0], [1], [0, 0, 1, 1], [], []>} : vector<16x32xf32>, vector<32x128xf32>, vector<16x128xf32> -> vector<16x128xf32>
    %70 = arith.addf %38, %69 : vector<16x128xf32>
    %c2 = arith.constant 2 : index
    %c0_50 = arith.constant 0 : index
    %c0_51 = arith.constant 0 : index
    %71 = vector.load %arg3[%c2, %c0_50, %c0_51] : memref<4x128x32xf32, #tpu.memory_space<vmem>>, vector<1x128x32xf32>
    %72 = vector.shape_cast %71 : vector<1x128x32xf32> to vector<128x32xf32>
    %cst_52 = arith.constant dense<0.000000e+00> : vector<16x32xf32>
    %73 = tpu.matmul %1, %72, %cst_52 {dimension_numbers = #tpu.dot_dimension_numbers<[1], [0], [0], [1], [0, 0, 1, 1], [], []>} : vector<16x128xf32>, vector<128x32xf32>, vector<16x32xf32> -> vector<16x32xf32>
    %c2_53 = arith.constant 2 : index
    %c0_54 = arith.constant 0 : index
    %c0_55 = arith.constant 0 : index
    %74 = vector.load %arg4[%c2_53, %c0_54, %c0_55] : memref<4x128x32xf32, #tpu.memory_space<vmem>>, vector<1x128x32xf32>
    %75 = vector.shape_cast %74 : vector<1x128x32xf32> to vector<128x32xf32>
    %cst_56 = arith.constant dense<0.000000e+00> : vector<16x32xf32>
    %76 = tpu.matmul %1, %75, %cst_56 {dimension_numbers = #tpu.dot_dimension_numbers<[1], [0], [0], [1], [0, 0, 1, 1], [], []>} : vector<16x128xf32>, vector<128x32xf32>, vector<16x32xf32> -> vector<16x32xf32>
    %c2_57 = arith.constant 2 : index
    %c0_58 = arith.constant 0 : index
    %c0_59 = arith.constant 0 : index
    %77 = vector.load %arg5[%c2_57, %c0_58, %c0_59] : memref<4x128x32xf32, #tpu.memory_space<vmem>>, vector<1x128x32xf32>
    %78 = vector.shape_cast %77 : vector<1x128x32xf32> to vector<128x32xf32>
    %cst_60 = arith.constant dense<0.000000e+00> : vector<16x32xf32>
    %79 = tpu.matmul %1, %78, %cst_60 {dimension_numbers = #tpu.dot_dimension_numbers<[1], [0], [0], [1], [0, 0, 1, 1], [], []>} : vector<16x128xf32>, vector<128x32xf32>, vector<16x32xf32> -> vector<16x32xf32>
    %cst_61 = arith.constant dense<0.000000e+00> : vector<16x16xf32>
    %80 = tpu.matmul %73, %76, %cst_61 {dimension_numbers = #tpu.dot_dimension_numbers<[1], [1], [0], [0], [0, 0, 1, 0], [], []>} : vector<16x32xf32>, vector<16x32xf32>, vector<16x16xf32> -> vector<16x16xf32>
    %cst_62 = arith.constant 0.176776692 : f32
    %81 = vector.broadcast %cst_62 : f32 to vector<16x16xf32>
    %82 = arith.mulf %80, %81 : vector<16x16xf32>
    %cst_63 = arith.constant -1.000000e+09 : f32
    %83 = vector.shape_cast %5 : vector<1x16xi1> to vector<1x16xi1>
    %84 = vector.broadcast %83 : vector<1x16xi1> to vector<16x16xi1>
    %85 = vector.broadcast %cst_63 : f32 to vector<16x16xf32>
    %86 = arith.select %84, %85, %82 : vector<16x16xi1>, vector<16x16xf32>
    %cst_64 = arith.constant dense<0xFF800000> : vector<16xf32>
    %87 = vector.multi_reduction <maximumf>, %86, %cst_64 [1] : vector<16x16xf32> to vector<16xf32>
    %cst_65 = arith.constant 0xFF800000 : f32
    %88 = vector.broadcast %cst_65 : f32 to vector<16xf32>
    %89 = arith.maximumf %88, %87 : vector<16xf32>
    %90 = vector.shape_cast %89 : vector<16xf32> to vector<16x1xf32>
    %91 = vector.broadcast %90 : vector<16x1xf32> to vector<16x16xf32>
    %92 = arith.subf %86, %91 : vector<16x16xf32>
    %93 = math.exp %92 : vector<16x16xf32>
    %cst_66 = arith.constant dense<0.000000e+00> : vector<16xf32>
    %94 = vector.multi_reduction <add>, %93, %cst_66 [1] : vector<16x16xf32> to vector<16xf32>
    %95 = vector.shape_cast %94 : vector<16xf32> to vector<16x1xf32>
    %96 = vector.broadcast %95 : vector<16x1xf32> to vector<16x16xf32>
    %97 = arith.divf %93, %96 : vector<16x16xf32>
    %cst_67 = arith.constant dense<0.000000e+00> : vector<16x32xf32>
    %98 = tpu.matmul %97, %79, %cst_67 {dimension_numbers = #tpu.dot_dimension_numbers<[1], [0], [0], [1], [0, 0, 1, 1], [], []>} : vector<16x16xf32>, vector<16x32xf32>, vector<16x32xf32> -> vector<16x32xf32>
    %c2_68 = arith.constant 2 : index
    %c0_69 = arith.constant 0 : index
    %c0_70 = arith.constant 0 : index
    %99 = vector.load %arg6[%c2_68, %c0_69, %c0_70] : memref<4x32x128xf32, #tpu.memory_space<vmem>>, vector<1x32x128xf32>
    %100 = vector.shape_cast %99 : vector<1x32x128xf32> to vector<32x128xf32>
    %cst_71 = arith.constant dense<0.000000e+00> : vector<16x128xf32>
    %101 = tpu.matmul %98, %100, %cst_71 {dimension_numbers = #tpu.dot_dimension_numbers<[1], [0], [0], [1], [0, 0, 1, 1], [], []>} : vector<16x32xf32>, vector<32x128xf32>, vector<16x128xf32> -> vector<16x128xf32>
    %102 = arith.addf %70, %101 : vector<16x128xf32>
    %c3 = arith.constant 3 : index
    %c0_72 = arith.constant 0 : index
    %c0_73 = arith.constant 0 : index
    %103 = vector.load %arg3[%c3, %c0_72, %c0_73] : memref<4x128x32xf32, #tpu.memory_space<vmem>>, vector<1x128x32xf32>
    %104 = vector.shape_cast %103 : vector<1x128x32xf32> to vector<128x32xf32>
    %cst_74 = arith.constant dense<0.000000e+00> : vector<16x32xf32>
    %105 = tpu.matmul %1, %104, %cst_74 {dimension_numbers = #tpu.dot_dimension_numbers<[1], [0], [0], [1], [0, 0, 1, 1], [], []>} : vector<16x128xf32>, vector<128x32xf32>, vector<16x32xf32> -> vector<16x32xf32>
    %c3_75 = arith.constant 3 : index
    %c0_76 = arith.constant 0 : index
    %c0_77 = arith.constant 0 : index
    %106 = vector.load %arg4[%c3_75, %c0_76, %c0_77] : memref<4x128x32xf32, #tpu.memory_space<vmem>>, vector<1x128x32xf32>
    %107 = vector.shape_cast %106 : vector<1x128x32xf32> to vector<128x32xf32>
    %cst_78 = arith.constant dense<0.000000e+00> : vector<16x32xf32>
    %108 = tpu.matmul %1, %107, %cst_78 {dimension_numbers = #tpu.dot_dimension_numbers<[1], [0], [0], [1], [0, 0, 1, 1], [], []>} : vector<16x128xf32>, vector<128x32xf32>, vector<16x32xf32> -> vector<16x32xf32>
    %c3_79 = arith.constant 3 : index
    %c0_80 = arith.constant 0 : index
    %c0_81 = arith.constant 0 : index
    %109 = vector.load %arg5[%c3_79, %c0_80, %c0_81] : memref<4x128x32xf32, #tpu.memory_space<vmem>>, vector<1x128x32xf32>
    %110 = vector.shape_cast %109 : vector<1x128x32xf32> to vector<128x32xf32>
    %cst_82 = arith.constant dense<0.000000e+00> : vector<16x32xf32>
    %111 = tpu.matmul %1, %110, %cst_82 {dimension_numbers = #tpu.dot_dimension_numbers<[1], [0], [0], [1], [0, 0, 1, 1], [], []>} : vector<16x128xf32>, vector<128x32xf32>, vector<16x32xf32> -> vector<16x32xf32>
    %cst_83 = arith.constant dense<0.000000e+00> : vector<16x16xf32>
    %112 = tpu.matmul %105, %108, %cst_83 {dimension_numbers = #tpu.dot_dimension_numbers<[1], [1], [0], [0], [0, 0, 1, 0], [], []>} : vector<16x32xf32>, vector<16x32xf32>, vector<16x16xf32> -> vector<16x16xf32>
    %cst_84 = arith.constant 0.176776692 : f32
    %113 = vector.broadcast %cst_84 : f32 to vector<16x16xf32>
    %114 = arith.mulf %112, %113 : vector<16x16xf32>
    %cst_85 = arith.constant -1.000000e+09 : f32
    %115 = vector.shape_cast %5 : vector<1x16xi1> to vector<1x16xi1>
    %116 = vector.broadcast %115 : vector<1x16xi1> to vector<16x16xi1>
    %117 = vector.broadcast %cst_85 : f32 to vector<16x16xf32>
    %118 = arith.select %116, %117, %114 : vector<16x16xi1>, vector<16x16xf32>
    %cst_86 = arith.constant dense<0xFF800000> : vector<16xf32>
    %119 = vector.multi_reduction <maximumf>, %118, %cst_86 [1] : vector<16x16xf32> to vector<16xf32>
    %cst_87 = arith.constant 0xFF800000 : f32
    %120 = vector.broadcast %cst_87 : f32 to vector<16xf32>
    %121 = arith.maximumf %120, %119 : vector<16xf32>
    %122 = vector.shape_cast %121 : vector<16xf32> to vector<16x1xf32>
    %123 = vector.broadcast %122 : vector<16x1xf32> to vector<16x16xf32>
    %124 = arith.subf %118, %123 : vector<16x16xf32>
    %125 = math.exp %124 : vector<16x16xf32>
    %cst_88 = arith.constant dense<0.000000e+00> : vector<16xf32>
    %126 = vector.multi_reduction <add>, %125, %cst_88 [1] : vector<16x16xf32> to vector<16xf32>
    %127 = vector.shape_cast %126 : vector<16xf32> to vector<16x1xf32>
    %128 = vector.broadcast %127 : vector<16x1xf32> to vector<16x16xf32>
    %129 = arith.divf %125, %128 : vector<16x16xf32>
    %cst_89 = arith.constant dense<0.000000e+00> : vector<16x32xf32>
    %130 = tpu.matmul %129, %111, %cst_89 {dimension_numbers = #tpu.dot_dimension_numbers<[1], [0], [0], [1], [0, 0, 1, 1], [], []>} : vector<16x16xf32>, vector<16x32xf32>, vector<16x32xf32> -> vector<16x32xf32>
    %c3_90 = arith.constant 3 : index
    %c0_91 = arith.constant 0 : index
    %c0_92 = arith.constant 0 : index
    %131 = vector.load %arg6[%c3_90, %c0_91, %c0_92] : memref<4x32x128xf32, #tpu.memory_space<vmem>>, vector<1x32x128xf32>
    %132 = vector.shape_cast %131 : vector<1x32x128xf32> to vector<32x128xf32>
    %cst_93 = arith.constant dense<0.000000e+00> : vector<16x128xf32>
    %133 = tpu.matmul %130, %132, %cst_93 {dimension_numbers = #tpu.dot_dimension_numbers<[1], [0], [0], [1], [0, 0, 1, 1], [], []>} : vector<16x32xf32>, vector<32x128xf32>, vector<16x128xf32> -> vector<16x128xf32>
    %134 = arith.addf %102, %133 : vector<16x128xf32>
    %135 = arith.addf %134, %1 : vector<16x128xf32>
    %c0_94 = arith.constant 0 : index
    %c0_95 = arith.constant 0 : index
    %136 = vector.load %arg7[%c0_94, %c0_95] : memref<1x128xf32, #tpu.memory_space<vmem>>, vector<1x128xf32>
    %c0_96 = arith.constant 0 : index
    %c0_97 = arith.constant 0 : index
    %137 = vector.load %arg8[%c0_96, %c0_97] : memref<1x128xf32, #tpu.memory_space<vmem>>, vector<1x128xf32>
    %cst_98 = arith.constant dense<0.000000e+00> : vector<16xf32>
    %138 = vector.multi_reduction <add>, %135, %cst_98 [1] : vector<16x128xf32> to vector<16xf32>
    %139 = vector.shape_cast %138 : vector<16xf32> to vector<16x1xf32>
    %cst_99 = arith.constant 1.280000e+02 : f32
    %140 = vector.broadcast %cst_99 : f32 to vector<16x1xf32>
    %141 = arith.divf %139, %140 : vector<16x1xf32>
    %142 = vector.broadcast %141 : vector<16x1xf32> to vector<16x128xf32>
    %143 = arith.subf %135, %142 : vector<16x128xf32>
    %144 = vector.broadcast %141 : vector<16x1xf32> to vector<16x128xf32>
    %145 = arith.subf %135, %144 : vector<16x128xf32>
    %146 = arith.mulf %143, %145 : vector<16x128xf32>
    %cst_100 = arith.constant dense<0.000000e+00> : vector<16xf32>
    %147 = vector.multi_reduction <add>, %146, %cst_100 [1] : vector<16x128xf32> to vector<16xf32>
    %148 = vector.shape_cast %147 : vector<16xf32> to vector<16x1xf32>
    %cst_101 = arith.constant 1.280000e+02 : f32
    %149 = vector.broadcast %cst_101 : f32 to vector<16x1xf32>
    %150 = arith.divf %148, %149 : vector<16x1xf32>
    %151 = vector.broadcast %141 : vector<16x1xf32> to vector<16x128xf32>
    %152 = arith.subf %135, %151 : vector<16x128xf32>
    %cst_102 = arith.constant 9.99999974E-6 : f32
    %153 = vector.broadcast %cst_102 : f32 to vector<16x1xf32>
    %154 = arith.addf %150, %153 : vector<16x1xf32>
    %155 = math.rsqrt %154 : vector<16x1xf32>
    %156 = vector.broadcast %155 : vector<16x1xf32> to vector<16x128xf32>
    %157 = arith.mulf %152, %156 : vector<16x128xf32>
    %158 = vector.broadcast %136 : vector<1x128xf32> to vector<16x128xf32>
    %159 = arith.mulf %157, %158 : vector<16x128xf32>
    %160 = vector.broadcast %137 : vector<1x128xf32> to vector<16x128xf32>
    %161 = arith.addf %159, %160 : vector<16x128xf32>
    %c0_103 = arith.constant 0 : index
    %c0_104 = arith.constant 0 : index
    %162 = vector.load %arg9[%c0_103, %c0_104] : memref<128x256xf32, #tpu.memory_space<vmem>>, vector<128x256xf32>
    %cst_105 = arith.constant dense<0.000000e+00> : vector<16x256xf32>
    %163 = tpu.matmul %161, %162, %cst_105 {dimension_numbers = #tpu.dot_dimension_numbers<[1], [0], [0], [1], [0, 0, 1, 1], [], []>} : vector<16x128xf32>, vector<128x256xf32>, vector<16x256xf32> -> vector<16x256xf32>
    %c0_106 = arith.constant 0 : index
    %c0_107 = arith.constant 0 : index
    %164 = vector.load %arg10[%c0_106, %c0_107] : memref<1x256xf32, #tpu.memory_space<vmem>>, vector<1x256xf32>
    %165 = vector.broadcast %164 : vector<1x256xf32> to vector<16x256xf32>
    %166 = arith.addf %163, %165 : vector<16x256xf32>
    %cst_108 = arith.constant 0.000000e+00 : f32
    %167 = vector.broadcast %cst_108 : f32 to vector<16x256xf32>
    %168 = arith.maximumf %166, %167 : vector<16x256xf32>
    %c0_109 = arith.constant 0 : index
    %c0_110 = arith.constant 0 : index
    %169 = vector.load %arg11[%c0_109, %c0_110] : memref<256x128xf32, #tpu.memory_space<vmem>>, vector<256x128xf32>
    %cst_111 = arith.constant dense<0.000000e+00> : vector<16x128xf32>
    %170 = tpu.matmul %168, %169, %cst_111 {dimension_numbers = #tpu.dot_dimension_numbers<[1], [0], [0], [1], [0, 0, 1, 1], [], []>} : vector<16x256xf32>, vector<256x128xf32>, vector<16x128xf32> -> vector<16x128xf32>
    %c0_112 = arith.constant 0 : index
    %c0_113 = arith.constant 0 : index
    %171 = vector.load %arg12[%c0_112, %c0_113] : memref<1x128xf32, #tpu.memory_space<vmem>>, vector<1x128xf32>
    %172 = vector.broadcast %171 : vector<1x128xf32> to vector<16x128xf32>
    %173 = arith.addf %170, %172 : vector<16x128xf32>
    %174 = arith.addf %173, %161 : vector<16x128xf32>
    %c0_114 = arith.constant 0 : index
    %c0_115 = arith.constant 0 : index
    %175 = vector.load %arg13[%c0_114, %c0_115] : memref<1x128xf32, #tpu.memory_space<vmem>>, vector<1x128xf32>
    %c0_116 = arith.constant 0 : index
    %c0_117 = arith.constant 0 : index
    %176 = vector.load %arg14[%c0_116, %c0_117] : memref<1x128xf32, #tpu.memory_space<vmem>>, vector<1x128xf32>
    %cst_118 = arith.constant dense<0.000000e+00> : vector<16xf32>
    %177 = vector.multi_reduction <add>, %174, %cst_118 [1] : vector<16x128xf32> to vector<16xf32>
    %178 = vector.shape_cast %177 : vector<16xf32> to vector<16x1xf32>
    %cst_119 = arith.constant 1.280000e+02 : f32
    %179 = vector.broadcast %cst_119 : f32 to vector<16x1xf32>
    %180 = arith.divf %178, %179 : vector<16x1xf32>
    %181 = vector.broadcast %180 : vector<16x1xf32> to vector<16x128xf32>
    %182 = arith.subf %174, %181 : vector<16x128xf32>
    %183 = vector.broadcast %180 : vector<16x1xf32> to vector<16x128xf32>
    %184 = arith.subf %174, %183 : vector<16x128xf32>
    %185 = arith.mulf %182, %184 : vector<16x128xf32>
    %cst_120 = arith.constant dense<0.000000e+00> : vector<16xf32>
    %186 = vector.multi_reduction <add>, %185, %cst_120 [1] : vector<16x128xf32> to vector<16xf32>
    %187 = vector.shape_cast %186 : vector<16xf32> to vector<16x1xf32>
    %cst_121 = arith.constant 1.280000e+02 : f32
    %188 = vector.broadcast %cst_121 : f32 to vector<16x1xf32>
    %189 = arith.divf %187, %188 : vector<16x1xf32>
    %190 = vector.broadcast %180 : vector<16x1xf32> to vector<16x128xf32>
    %191 = arith.subf %174, %190 : vector<16x128xf32>
    %cst_122 = arith.constant 9.99999974E-6 : f32
    %192 = vector.broadcast %cst_122 : f32 to vector<16x1xf32>
    %193 = arith.addf %189, %192 : vector<16x1xf32>
    %194 = math.rsqrt %193 : vector<16x1xf32>
    %195 = vector.broadcast %194 : vector<16x1xf32> to vector<16x128xf32>
    %196 = arith.mulf %191, %195 : vector<16x128xf32>
    %197 = vector.broadcast %175 : vector<1x128xf32> to vector<16x128xf32>
    %198 = arith.mulf %196, %197 : vector<16x128xf32>
    %199 = vector.broadcast %176 : vector<1x128xf32> to vector<16x128xf32>
    %200 = arith.addf %198, %199 : vector<16x128xf32>
    %c0_123 = arith.constant 0 : index
    %c0_124 = arith.constant 0 : index
    %c0_125 = arith.constant 0 : index
    %201 = vector.load %arg15[%c0_123, %c0_124, %c0_125] : memref<1x16x128xf32, #tpu.memory_space<vmem>>, vector<1x16x128xf32>
    %202 = vector.shape_cast %201 : vector<1x16x128xf32> to vector<16x128xf32>
    %203 = vector.shape_cast %200 : vector<16x128xf32> to vector<1x16x128xf32>
    tpu.vector_store %arg15[%c0_123, %c0_124, %c0_125], %203 {strides = array<i32>} : memref<1x16x128xf32, #tpu.memory_space<vmem>>, vector<1x16x128xf32>,
    return
  }
  func.func @transform_0(%arg0: i32) -> (i32, i32, i32) {
    %c0_i32 = arith.constant 0 : i32
    %c0_i32_0 = arith.constant 0 : i32
    %c0_i32_1 = arith.constant 0 : i32
    return %arg0, %c0_i32, %c0_i32_0 : i32, i32, i32
  }
  func.func @transform_1(%arg0: i32) -> (i32, i32, i32) {
    %c0_i32 = arith.constant 0 : i32
    %c0_i32_0 = arith.constant 0 : i32
    %c0_i32_1 = arith.constant 0 : i32
    return %arg0, %c0_i32, %c0_i32_0 : i32, i32, i32
  }
  func.func @transform_2(%arg0: i32) -> (i32, i32, i32) {
    %c0_i32 = arith.constant 0 : i32
    %c0_i32_0 = arith.constant 0 : i32
    %c0_i32_1 = arith.constant 0 : i32
    %c0_i32_2 = arith.constant 0 : i32
    return %c0_i32, %c0_i32_0, %c0_i32_1 : i32, i32, i32
  }
  func.func @transform_3(%arg0: i32) -> (i32, i32, i32) {
    %c0_i32 = arith.constant 0 : i32
    %c0_i32_0 = arith.constant 0 : i32
    %c0_i32_1 = arith.constant 0 : i32
    %c0_i32_2 = arith.constant 0 : i32
    return %c0_i32, %c0_i32_0, %c0_i32_1 : i32, i32, i32
  }
  func.func @transform_4(%arg0: i32) -> (i32, i32, i32) {
    %c0_i32 = arith.constant 0 : i32
    %c0_i32_0 = arith.constant 0 : i32
    %c0_i32_1 = arith.constant 0 : i32
    %c0_i32_2 = arith.constant 0 : i32
    return %c0_i32, %c0_i32_0, %c0_i32_1 : i32, i32, i32
  }
  func.func @transform_5(%arg0: i32) -> (i32, i32, i32) {
    %c0_i32 = arith.constant 0 : i32
    %c0_i32_0 = arith.constant 0 : i32
    %c0_i32_1 = arith.constant 0 : i32
    %c0_i32_2 = arith.constant 0 : i32
    return %c0_i32, %c0_i32_0, %c0_i32_1 : i32, i32, i32
  }
  func.func @transform_6(%arg0: i32) -> (i32, i32) {
    %c0_i32 = arith.constant 0 : i32
    %c0_i32_0 = arith.constant 0 : i32
    %c0_i32_1 = arith.constant 0 : i32
    return %c0_i32, %c0_i32_0 : i32, i32
  }
  func.func @transform_7(%arg0: i32) -> (i32, i32) {
    %c0_i32 = arith.constant 0 : i32
    %c0_i32_0 = arith.constant 0 : i32
    %c0_i32_1 = arith.constant 0 : i32
    return %c0_i32, %c0_i32_0 : i32, i32
  }
  func.func @transform_8(%arg0: i32) -> (i32, i32) {
    %c0_i32 = arith.constant 0 : i32
    %c0_i32_0 = arith.constant 0 : i32
    %c0_i32_1 = arith.constant 0 : i32
    return %c0_i32, %c0_i32_0 : i32, i32
  }
  func.func @transform_9(%arg0: i32) -> (i32, i32) {
    %c0_i32 = arith.constant 0 : i32
    %c0_i32_0 = arith.constant 0 : i32
    %c0_i32_1 = arith.constant 0 : i32
    return %c0_i32, %c0_i32_0 : i32, i32
  }
  func.func @transform_10(%arg0: i32) -> (i32, i32) {
    %c0_i32 = arith.constant 0 : i32
    %c0_i32_0 = arith.constant 0 : i32
    %c0_i32_1 = arith.constant 0 : i32
    return %c0_i32, %c0_i32_0 : i32, i32
  }
  func.func @transform_11(%arg0: i32) -> (i32, i32) {
    %c0_i32 = arith.constant 0 : i32
    %c0_i32_0 = arith.constant 0 : i32
    %c0_i32_1 = arith.constant 0 : i32
    return %c0_i32, %c0_i32_0 : i32, i32
  }
  func.func @transform_12(%arg0: i32) -> (i32, i32) {
    %c0_i32 = arith.constant 0 : i32
    %c0_i32_0 = arith.constant 0 : i32
    %c0_i32_1 = arith.constant 0 : i32
    return %c0_i32, %c0_i32_0 : i32, i32
  }
  func.func @transform_13(%arg0: i32) -> (i32, i32) {
    %c0_i32 = arith.constant 0 : i32
    %c0_i32_0 = arith.constant 0 : i32
    %c0_i32_1 = arith.constant 0 : i32
    return %c0_i32, %c0_i32_0 : i32, i32
  }
  func.func @transform_14(%arg0: i32) -> (i32, i32, i32) {
    %c0_i32 = arith.constant 0 : i32
    %c0_i32_0 = arith.constant 0 : i32
    %c0_i32_1 = arith.constant 0 : i32
    return %arg0, %c0_i32, %c0_i32_0 : i32, i32, i32
  }
}

</mosaic_0001>

<bundles_post_ra>
// kernel: tpu_custom_call.1
= control target key start
LH: loop header
LB: loop body
LE: loop exit
PB: predicated region body
PF: predicated region fallthrough
CT: control target
= control target key end

     0   :  { %s3476_s0 = inlined_call_operand.vmem [shape: f32[2,16,128], index: 0, kind: input, shape index: {}]   ;;  %s3477_s1 = inlined_call_operand.vmem [shape: s32[2,1,16], index: 1, kind: input, shape index: {}]   ;;  %s3478_s2 = inlined_call_operand.vmem [shape: f32[4,128,32], index: 2, kind: input, shape index: {}]   ;;  %s3479_s3 = inlined_call_operand.vmem [shape: f32[4,128,32], index: 3, kind: input, shape index: {}]   ;;  %s3480_s4 = inlined_call_operand.vmem [shape: f32[4,128,32], index: 4, kind: input, shape index: {}]   ;;  %s3481_s5 = inlined_call_operand.vmem [shape: f32[4,32,128], index: 5, kind: input, shape index: {}]   ;;  %s3482_s6 = inlined_call_operand.vmem [shape: f32[1,128], index: 6, kind: input, shape index: {}]   ;;  %s3483_s7 = inlined_call_operand.vmem [shape: f32[1,128], index: 7, kind: input, shape index: {}]   ;;  %s3484_s8 = inlined_call_operand.vmem [shape: f32[128,256], index: 8, kind: input, shape index: {}]   ;;  %s3485_s9 = inlined_call_operand.vmem [shape: f32[1,256], index: 9, kind: input, shape index: {}]   ;;  %s3486_s10 = inlined_call_operand.vmem [shape: f32[256,128], index: 10, kind: input, shape index: {}]   ;;  %s3487_s11 = inlined_call_operand.vmem [shape: f32[1,128], index: 11, kind: input, shape index: {}]   ;;  %s3488_s12 = inlined_call_operand.vmem [shape: f32[1,128], index: 12, kind: input, shape index: {}]   ;;  %s3489_s13 = inlined_call_operand.vmem [shape: f32[1,128], index: 13, kind: input, shape index: {}]   ;;  %s3490_s14 = inlined_call_operand.hbm [shape: f32[2,16,128], index: 14, kind: output, shape index: {}]  }
   0x1   :  { %3497 = sst [smem:[#allocation11_spill]] %s3476_s0 }
   0x2   :  { %19 = vsyncpa [#allocation3], 0 }
   0x3   :  { %21 = vsyncpa [#allocation3 + $0x1], 0  ;;  %s2380_s29 = smov 0   ;;  %s2382_s30 = smov 0  }
   0x4   :  { %s2384_s15 = smov 0   ;;  %s2386_s16 = smov 0  }
   0x5 LB: > { %3498 = sst [smem:[#allocation5_spill]] %s2287_s29  ;;  %s2401_s17 = sadd.s32 4294967295, %s2299_s16   ;;  %s2299_s16 = sphi %s2386_s16, %s3512_s16   ;;  %s2295_s15 = sphi %s2384_s15, %s3514_s15   ;;  %s2291_s30 = sphi %s2382_s30, %s3516_s30   ;;  %s2287_s29 = sphi %s2380_s29, %s3515_s29  }
   0x6   : > { %3499 = sst [smem:[#allocation6_spill]] %s2295_s15  ;;  %s1943_s18 = sadd.s32 4294967294, %s2299_s16  }
   0x7   : > { %3500 = sst [smem:[#allocation7_spill]] %s2299_s16  ;;  %s2405_s19 = sadd.s32 1, %s2299_s16  }
   0x8   : > { %3501 = sst [smem:[#allocation8_spill]] %s2405_s19  ;;  %s338_s20 = sadd.s32 1, %s2295_s15 }
   0x9   : > { %s335_s21 = ssub.s32 %s2299_s16, %s2405_s19  ;;  %p348_p0 = scmp.ne.s32.totalorder %s2295_s15, %s2291_s30 }
   0xa   : > { %p336_p1 = scmp.eq.s32.totalorder %s335_s21, 0  ;;  %p349_p2 = scmp.eq.s32.totalorder %s2401_s17, 1 }
   0xb   : > { %p354_p3 = scmp.ne.s32.totalorder %s2291_s30, %s2287_s29  ;;  %p355_p4 = scmp.eq.s32.totalorder %s1943_s18, 1 }
   0xc   : > { %s2416_s22 = scalar_select %p336_p1, %s2295_s15, %s338_s20  }
   0xd   : > { %p2418_p5 = por %p349_p2, %p348_p0  ;;  %p2422_p6 = por %p355_p4, %p354_p3 }
   0xe   : > { %3502 = sst [smem:[#allocation9_spill]] %s2416_s22  ;;  %p1946_p7 = scmp.ge.s32.totalorder %s2299_s16, 1 }
   0xf   : > { %s3504_s24 = scalar_select %p2422_p6, 1, 0 }
  0x10   : > { %p423_p8 = scmp.lt.s32.totalorder %s2299_s16, 3 }
  0x11   : > { %3505 = sst [smem:[#allocation10_spill]] %s3504_s24 }
  0x12   : > { %p424_p9 = pnand %p1946_p7, %p423_p8 }
  0x13   : > { %p472_p10 = scmp.lt.s32.totalorder (!%p424_p9), %s2401_s17, 1  ;;  %s3506_s0 = sld [smem:[#allocation11_spill]] (!%p424_p9) }
  0x14   : > { %427 = sbr.rel (%p424_p9) target bundleno = 3309 (0xced), region = 76  ;;  %s2144_s15 = sshll.u32 (!%p424_p9), %s2401_s17, 4 }
  0x15   : > { %s1868_s24 = scalar_lea.hbm (!%p424_p9), %s3490_s14, %s2144_s15  ;;  %s2257_s21 = scalar_lea.hbm (!%p424_p9), %s3490_s14, 32 }
  0x16   : > { %s1871_s18 = sshll.u32 (!%p424_p9), %s1868_s24, 4  ;;  %s1872_s18 = int_to_ptr.hbm [resolvable:$true] %s1871_s18 }
  0x19   : > { %v538_v0 = vld [vmem:[%s3479_s3 + $0x78] sm:$0xff]  ;;  %v537_v1 = vld [vmem:[%s3479_s3 + $0x70] sm:$0xff]  ;;  %v536_v2 = vld [vmem:[%s3479_s3 + $0x68] sm:$0xff]  ;;  %s2493_s27 = scalar_select %p472_p10, %s2401_s17, 1  ;;  %vm601_vm0 = vcmask 261120   ;;  %v2301_v46 = vmov 0  }
  0x1a   : > { %539 = vmatpush.msra.mxu1 %v538_v0  ;;  %v499_v3 = vld [vmem:[%s3478_s2 + $0x78] sm:$0xff]  ;;  %v498_v4 = vld [vmem:[%s3478_s2 + $0x70] sm:$0xff]  ;;  %v535_v5 = vld [vmem:[%s3479_s3 + $0x60] sm:$0xff]  ;;  %vm644_vm3 = vcmask 130048  }
  0x1b   : > { %500 = vmatpush.msra.mxu0 %v499_v3  ;;  %v497_v6 = vld [vmem:[%s3478_s2 + $0x68] sm:$0xff]  ;;  %v534_v7 = vld [vmem:[%s3479_s3 + $0x58] sm:$0xff]  ;;  %v496_v8 = vld [vmem:[%s3478_s2 + $0x60] sm:$0xff]  ;;  %s2143_s26 = sshll.u32 %s2493_s27, 4  ;;  %s479_s20 = scalar_lea.vmem %s3477_s1, %s2493_s27 }
  0x1c   : > { %540 = vmatpush.msra.mxu1 %v537_v1  ;;  %v533_v9 = vld [vmem:[%s3479_s3 + $0x50] sm:$0xff]  ;;  %v495_v10 = vld [vmem:[%s3478_s2 + $0x58] sm:$0xff]  ;;  %v532_v11 = vld [vmem:[%s3479_s3 + $0x48] sm:$0xff]  ;;  %s2520_s25 = scalar_lea.vmem %s3506_s0, %s2143_s26  ;;  %s2251_s26 = sshra.s32 %s1872_s18, 4  ;;  %s2252_s26 = int_to_ptr.hbm [resolvable:$true] %s2251_s26 }
  0x1d   : > { %501 = vmatpush.msra.mxu0 %v498_v4  ;;  %v531_v12 = vld [vmem:[%s3479_s3 + $0x40] sm:$0xff]  ;;  %v494_v13 = vld [vmem:[%s3478_s2 + $0x50] sm:$0xff]  ;;  %v493_v14 = vld [vmem:[%s3478_s2 + $0x48] sm:$0xff]  ;;  %s2253_s22 = scalar_lea.hbm %s2252_s26, 16  ;;  %p2258_p0 = scmp.lt.s32.totalorder %s2252_s26, %s3490_s14 }
  0x1e   : > { %541 = vmatpush.msra.mxu1 %v536_v2  ;;  %v530_v15 = vld [vmem:[%s3479_s3 + $0x38] sm:$0xff]  ;;  %v492_v16 = vld [vmem:[%s3478_s2 + $0x40] sm:$0xff]  ;;  %v529_v17 = vld [vmem:[%s3479_s3 + $0x30] sm:$0xff]  ;;  %p2254_p11 = scmp.ne.s32.totalorder %s2252_s26, %s2253_s22  ;;  %p2259_p1 = scmp.lt.s32.totalorder %s2257_s21, %s2253_s22 }
  0x1f   : > { %502 = vmatpush.msra.mxu0 %v497_v6  ;;  %v491_v18 = vld [vmem:[%s3478_s2 + $0x38] sm:$0xff]  ;;  %v528_v19 = vld [vmem:[%s3479_s3 + $0x28] sm:$0xff]  ;;  %v490_v20 = vld [vmem:[%s3478_s2 + $0x30] sm:$0xff] }
  0x20   : > { %542 = vmatpush.msra.mxu1 %v535_v5  ;;  %v527_v21 = vld [vmem:[%s3479_s3 + $0x20] sm:$0xff]  ;;  %v489_v22 = vld [vmem:[%s3478_s2 + $0x28] sm:$0xff]  ;;  %v526_v23 = vld [vmem:[%s3479_s3 + $0x18] sm:$0xff]  ;;  %p2255_p12 = pnand %p2254_p11, %p2418_p5  ;;  %p2260_p2 = por %p2259_p1, %p2258_p0 }
  0x21   : > { %503 = vmatpush.msra.mxu0 %v496_v8  ;;  %v488_v24 = vld [vmem:[%s3478_s2 + $0x20] sm:$0xff]  ;;  %v525_v25 = vld [vmem:[%s3479_s3 + $0x10] sm:$0xff]  ;;  %v487_v26 = vld [vmem:[%s3478_s2 + $0x18] sm:$0xff] }
  0x22   : > { %543 = vmatpush.msra.mxu1 %v534_v7  ;;  %v524_v27 = vld [vmem:[%s3479_s3 + $0x8] sm:$0xff]  ;;  %v486_v28 = vld [vmem:[%s3478_s2 + $0x10] sm:$0xff]  ;;  %v523_v29 = vld [vmem:[%s3479_s3] sm:$0xff]  ;;  %p2256_p13 = pneg %p2255_p12 }
  0x23   : > { %504 = vmatpush.msra.mxu0 %v495_v10  ;;  %v485_v30 = vld [vmem:[%s3478_s2 + $0x8] sm:$0xff]  ;;  %v2532_v31 = vld [vmem:[%s2520_s25] sm:$0xff]  ;;  %v577_v38 = vld [vmem:[%s3480_s4 + $0x78] sm:$0xff] }
  0x24   : > { %544 = vmatpush.msra.mxu1 %v533_v9  ;;  %v484_v32 = vld [vmem:[%s3478_s2] sm:$0xff]  ;;  %v2540_v33 = vld [vmem:[%s2520_s25 + $0x8] sm:$0xff]  ;;  %v576_v39 = vld [vmem:[%s3480_s4 + $0x70] sm:$0xff]  ;;  %578 = vmatpush.msra.mxu2 %v577_v38  ;;  %p2261_p3 = pnand %p2260_p2, %p2256_p13 }
  0x25   : > { %505 = vmatpush.msra.mxu0 %v494_v13  ;;  %v575_v40 = vld [vmem:[%s3480_s4 + $0x68] sm:$0xff]  ;;  %v574_v41 = vld [vmem:[%s3480_s4 + $0x60] sm:$0xff]  ;;  %v573_v43 = vld [vmem:[%s3480_s4 + $0x58] sm:$0xff] }
  0x26   : > { %545 = vmatpush.msra.mxu1 %v532_v11  ;;  %579 = vmatpush.msra.mxu2 %v576_v39  ;;  %v482_v42 = vld [vmem:[%s479_s20] sm:$0x1]  ;;  %v572_v44 = vld [vmem:[%s3480_s4 + $0x50] sm:$0xff]  ;;  %v571_v45 = vld [vmem:[%s3480_s4 + $0x48] sm:$0xff]  ;;  %s469_s20 = sand.u32 1, %s2291_s30  }
  0x27   : > { %506 = vmatpush.msra.mxu0 %v493_v14  ;;  %vm483_vm1 = vcmp.ne.s32.totalorder %v482_v42, 0  ;;  %v570_v48 = vld [vmem:[%s3480_s4 + $0x40] sm:$0xff]  ;;  %v569_v49 = vld [vmem:[%s3480_s4 + $0x38] sm:$0xff]  ;;  %v568_v51 = vld [vmem:[%s3480_s4 + $0x30] sm:$0xff]  ;;  %s1947_s29 = sshll.u32 %s469_s20, 4  ;;  %s1857_s17 = scalar_lea.sflag [#allocation3], %s469_s20 }
  0x28   : > { %546 = vmatpush.msra.mxu1 %v531_v12  ;;  %580 = vmatpush.msra.mxu2 %v575_v40  ;;  %v639_v47 = vsel %vm483_vm1, 1, %v2301_v46  ;;  %v567_v52 = vld [vmem:[%s3480_s4 + $0x28] sm:$0xff]  ;;  %v566_v56 = vld [vmem:[%s3480_s4 + $0x20] sm:$0xff]  ;;  %v565_v58 = vld [vmem:[%s3480_s4 + $0x18] sm:$0xff]  ;;  %s471_s28 = scalar_lea.vmem [#allocation2], %s1947_s29 }
  0x29   : > { %507 = vmatpush.msra.mxu0 %v492_v16  ;;  %v640_v50 = vperm.slane %v639_v47, 0  ;;  %v564_v60 = vld [vmem:[%s3480_s4 + $0x10] sm:$0xff]  ;;  %v563_v61 = vld [vmem:[%s3480_s4 + $0x8] sm:$0xff]  ;;  %v562_v0 = vld [vmem:[%s3480_s4] sm:$0xff] }
  0x2a   : > { %547 = vmatpush.msra.mxu1 %v530_v15  ;;  %581 = vmatpush.msra.mxu2 %v574_v41  ;;  %v1987_v3 = vld [vmem:[%s3479_s3 + $0xf8] sm:$0xff]  ;;  %v1986_v4 = vld [vmem:[%s3479_s3 + $0xf0] sm:$0xff]  ;;  %v1985_v5 = vld [vmem:[%s3479_s3 + $0xe8] sm:$0xff] }
  0x2b   : > { %508 = vmatpush.msra.mxu0 %v491_v18  ;;  %vm2585_vm2 = vcmp.eq.s32.totalorder %v640_v50, 1  ;;  %v1984_v6 = vld [vmem:[%s3479_s3 + $0xe0] sm:$0xff]  ;;  %v1983_v9 = vld [vmem:[%s3479_s3 + $0xd8] sm:$0xff]  ;;  %v1982_v11 = vld [vmem:[%s3479_s3 + $0xd0] sm:$0xff] }
  0x2c   : > { %548 = vmatpush.msra.mxu1 %v529_v17  ;;  %582 = vmatpush.msra.mxu2 %v573_v43  ;;  %v1981_v12 = vld [vmem:[%s3479_s3 + $0xc8] sm:$0xff]  ;;  %v1980_v13 = vld [vmem:[%s3479_s3 + $0xc0] sm:$0xff]  ;;  %v1979_v14 = vld [vmem:[%s3479_s3 + $0xb8] sm:$0xff] }
  0x2d   : > { %509 = vmatpush.msra.mxu0 %v490_v20  ;;  %v1966_v38 = vld [vmem:[%s3478_s2 + $0xd0] sm:$0xff]  ;;  %v1965_v39 = vld [vmem:[%s3478_s2 + $0xc8] sm:$0xff]  ;;  %v1964_v40 = vld [vmem:[%s3478_s2 + $0xc0] sm:$0xff] }
  0x2e   : > { %549 = vmatpush.msra.mxu1 %v528_v19  ;;  %583 = vmatpush.msra.mxu2 %v572_v44  ;;  %v1963_v41 = vld [vmem:[%s3478_s2 + $0xb8] sm:$0xff]  ;;  %v1962_v42 = vld [vmem:[%s3478_s2 + $0xb0] sm:$0xff]  ;;  %v1961_v43 = vld [vmem:[%s3478_s2 + $0xa8] sm:$0xff] }
  0x2f   : > { %510 = vmatpush.msra.mxu0 %v489_v22  ;;  %v1960_v44 = vld [vmem:[%s3478_s2 + $0xa0] sm:$0xff]  ;;  %v1958_v46 = vld [vmem:[%s3478_s2 + $0x90] sm:$0xff]  ;;  %v1957_v47 = vld [vmem:[%s3478_s2 + $0x88] sm:$0xff] }
  0x30   : > { %550 = vmatpush.msra.mxu1 %v527_v21  ;;  %584 = vmatpush.msra.mxu2 %v571_v45  ;;  %v1959_v45 = vld [vmem:[%s3478_s2 + $0x98] sm:$0xff] }
  0x31   : > { %511 = vmatpush.msra.mxu0 %v488_v24  ;;  %v1978_v24 = vld [vmem:[%s3479_s3 + $0xb0] sm:$0xff] }
  0x32   : > { %551 = vmatpush.msra.mxu1 %v526_v23  ;;  %585 = vmatpush.msra.mxu2 %v570_v48 }
  0x33   : > { %512 = vmatpush.msra.mxu0 %v487_v26  ;;  %v1971_v26 = vld [vmem:[%s3478_s2 + $0xf8] sm:$0xff] }
  0x34   : > { %552 = vmatpush.msra.mxu1 %v525_v25  ;;  %586 = vmatpush.msra.mxu2 %v569_v49  ;;  %v1977_v25 = vld [vmem:[%s3479_s3 + $0xa8] sm:$0xff]  ;;  %v1956_v49 = vld [vmem:[%s3478_s2 + $0x80] sm:$0xff] }
  0x35   : > { %513 = vmatpush.msra.mxu0 %v486_v28  ;;  %v1970_v28 = vld [vmem:[%s3478_s2 + $0xf0] sm:$0xff] }
  0x36   : > { %553 = vmatpush.msra.mxu1 %v524_v27  ;;  %587 = vmatpush.msra.mxu2 %v568_v51  ;;  %v1976_v27 = vld [vmem:[%s3479_s3 + $0xa0] sm:$0xff] }
  0x37   : > { %514 = vmatpush.msra.mxu0 %v485_v30  ;;  %v1969_v30 = vld [vmem:[%s3478_s2 + $0xe8] sm:$0xff] }
  0x38   : > { %554 = vmatpush.msra.mxu1 %v523_v29  ;;  %588 = vmatpush.msra.mxu2 %v567_v52  ;;  %v1975_v29 = vld [vmem:[%s3479_s3 + $0x98] sm:$0xff] }
  0x39   : > { %555 = vmatmul.f32.vlgmr.msra.gmra.mxu1 %v2532_v31  ;;  %515 = vmatpush.msra.mxu0 %v484_v32  ;;  %v1974_v32 = vld [vmem:[%s3479_s3 + $0x90] sm:$0xff] }
  0x3a   : > { %516 = vmatmul.f32.vlgmr.msra.gmra.mxu0 %v2532_v31  ;;  %589 = vmatpush.msra.mxu2 %v566_v56 }
  0x3b   : > { %783 = vmatpush.msrb.mxu0 %v1987_v3 }
  0x3c   : > { %590 = vmatpush.msra.mxu2 %v565_v58 }
  0x3d   : > { %784 = vmatpush.msrb.mxu0 %v1986_v4 }
  0x3e   : > { %591 = vmatpush.msra.mxu2 %v564_v60 }
  0x3f   : > { %785 = vmatpush.msrb.mxu0 %v1985_v5 }
  0x40   : > { %592 = vmatpush.msra.mxu2 %v563_v61 }
  0x41   : > { %558 = vmatmul.f32.gmra.mxu1 %v2540_v33  ;;  %786 = vmatpush.msrb.mxu0 %v1984_v6 }
  0x42   : > { %519 = vmatmul.f32.gmra.mxu0 %v2540_v33  ;;  %593 = vmatpush.msra.mxu2 %v562_v0 }
  0x43   : > { %594 = vmatmul.f32.vlgmr.msra.gmra.mxu2 %v2532_v31  ;;  %787 = vmatpush.msrb.mxu0 %v1983_v9 }
  0x45   : > { %788 = vmatpush.msrb.mxu0 %v1982_v11  ;;  %v724_v11 = vld [vmem:[%s3481_s5 + $0x10] sm:$0xff] }
  0x47   : > { %789 = vmatpush.msrb.mxu0 %v1981_v12  ;;  %v723_v12 = vld [vmem:[%s3481_s5 + $0x8] sm:$0xff] }
  0x49   : > { %790 = vmatpush.msrb.mxu0 %v1980_v13 }
  0x4b   : > { %597 = vmatmul.f32.gmra.mxu2 %v2540_v33  ;;  %791 = vmatpush.msrb.mxu0 %v1979_v14 }
  0x4d   : > { %792 = vmatpush.msrb.mxu0 %v1978_v24  ;;  %v1999_v24 = vld [vmem:[%s3480_s4 + $0xd8] sm:$0xff] }
  0x4f   : > { %793 = vmatpush.msrb.mxu0 %v1977_v25  ;;  %v1998_v25 = vld [vmem:[%s3480_s4 + $0xd0] sm:$0xff] }
  0x51   : > { %794 = vmatpush.msrb.mxu0 %v1976_v27  ;;  %v1996_v27 = vld [vmem:[%s3480_s4 + $0xc0] sm:$0xff] }
  0x53   : > { %795 = vmatpush.msrb.mxu0 %v1975_v29  ;;  %v1994_v29 = vld [vmem:[%s3480_s4 + $0xb0] sm:$0xff] }
  0x55   : > { %796 = vmatpush.msrb.mxu0 %v1974_v32 }
  0xb6   : > { %v556_v34 = vpop.f32.mrf.mxu1 }
  0xb7   : > { %v517_v36 = vpop.f32.mrf.mxu0 }
  0xbe   : > { %v559_v35 = vpop.f32.mrf.mxu1 }
  0xbf   : > { %1950 = vmatpush.xpose.msk.msra.mxu3 %vm601_vm0, %v559_v35  ;;  %v520_v37 = vpop.f32.mrf.mxu0  ;;  %v1973_v35 = vld [vmem:[%s3479_s3 + $0x88] sm:$0xff] }
  0xc0   : > { %797 = vmatpush.msrb.mxu0 %v1973_v35  ;;  %v1992_v35 = vld [vmem:[%s3480_s4 + $0xa0] sm:$0xff] }
  0xc3   : > { %1951 = vmatpush.xpose.msk.msra.mxu3 %vm601_vm0, %v556_v34  ;;  %v1968_v34 = vld [vmem:[%s3478_s2 + $0xe0] sm:$0xff] }
  0xc6   : > { %1952 = vmatmul.msk.f32.vlgmr.msra.gmra.mxu3 %vm601_vm0, %v517_v36  ;;  %v595_v22 = vpop.f32.mrf.mxu2  ;;  %v1967_v36 = vld [vmem:[%s3478_s2 + $0xd8] sm:$0xff] }
  0xce   : > { %1953 = vmatmul.msk.f32.gmra.mxu3 %vm601_vm0, %v520_v37  ;;  %v598_v23 = vpop.f32.mrf.mxu2  ;;  %v1972_v37 = vld [vmem:[%s3479_s3 + $0x80] sm:$0xff] }
  0xcf   : > { %713 = vmatpush.msrb.mxu3 %v598_v23  ;;  %798 = vmatpush.msrb.mxu0 %v1972_v37  ;;  %v2000_v23 = vld [vmem:[%s3480_s4 + $0xe0] sm:$0xff]  ;;  %v1991_v37 = vld [vmem:[%s3480_s4 + $0x98] sm:$0xff] }
  0xd0   : > { %799 = vmatmul.f32.vlgmr.msrb.gmra.mxu0 %v2532_v31 }
  0xd1   : > { %714 = vmatpush.msrb.mxu3 %v595_v22  ;;  %v2001_v22 = vld [vmem:[%s3480_s4 + $0xe8] sm:$0xff] }
  0xd3   : > { %743 = vmatpush.msra.mxu3 %v1971_v26  ;;  %v1997_v26 = vld [vmem:[%s3480_s4 + $0xc8] sm:$0xff] }
  0xd5   : > { %744 = vmatpush.msra.mxu3 %v1970_v28  ;;  %v1995_v28 = vld [vmem:[%s3480_s4 + $0xb8] sm:$0xff] }
  0xd7   : > { %745 = vmatpush.msra.mxu3 %v1969_v30  ;;  %v1993_v30 = vld [vmem:[%s3480_s4 + $0xa8] sm:$0xff] }
  0xd8   : > { %802 = vmatmul.f32.gmra.mxu0 %v2540_v33 }
  0xd9   : > { %746 = vmatpush.msra.mxu3 %v1968_v34 }
  0xdb   : > { %747 = vmatpush.msra.mxu3 %v1967_v36 }
  0xdd   : > { %748 = vmatpush.msra.mxu3 %v1966_v38 }
  0xdf   : > { %749 = vmatpush.msra.mxu3 %v1965_v39  ;;  %v1990_v39 = vld [vmem:[%s3480_s4 + $0x90] sm:$0xff] }
  0xe1   : > { %750 = vmatpush.msra.mxu3 %v1964_v40  ;;  %v1989_v40 = vld [vmem:[%s3480_s4 + $0x88] sm:$0xff] }
  0xe3   : > { %751 = vmatpush.msra.mxu3 %v1963_v41 }
  0xe5   : > { %752 = vmatpush.msra.mxu3 %v1962_v42 }
  0xe7   : > { %753 = vmatpush.msra.mxu3 %v1961_v43  ;;  %v1988_v43 = vld [vmem:[%s3480_s4 + $0x80] sm:$0xff] }
  0xe9   : > { %754 = vmatpush.msra.mxu3 %v1960_v44 }
  0xeb   : > { %755 = vmatpush.msra.mxu3 %v1959_v45 }
  0xed   : > { %756 = vmatpush.msra.mxu3 %v1958_v46 }
  0xef   : > { %757 = vmatpush.msra.mxu3 %v1957_v47 }
  0xf1   : > { %758 = vmatpush.msra.mxu3 %v1956_v49 }
 0x149   : > { %v631_v53 = vpop.f32.mrf.mxu3 }
 0x14a   : > { %v637_v55 = vmul.f32 0.17677669, %v631_v53 }
 0x14c   : > { %v642_v57 = vsel %vm2585_vm2, -1e+09, %v637_v55 }
 0x14d   : > { %v645_v59 = vsel %vm644_vm3, %v642_v57, -inf  ;;  %v800_v13 = vpop.f32.mrf.mxu0 }
 0x14e   : > { %646 = vmax.xlane.f32.xlu0 %v645_v59 }
 0x151   : > { %v634_v62 = vpop.f32.mrf.mxu3 }
 0x152   : > { %v638_v63 = vmul.f32 0.17677669, %v634_v62 }
 0x154   : > { %v643_v1 = vsel %vm2585_vm2, -1e+09, %v638_v63 }
 0x155   : > { %v648_v2 = vsel %vm644_vm3, %v643_v1, -inf  ;;  %v803_v14 = vpop.f32.mrf.mxu0 }
 0x156   : > { %649 = vmax.xlane.f32.xlu0 %v648_v2  ;;  %2004 = vmatpush.xpose.msk.msrb.mxu2 %vm601_vm0, %v803_v14  ;;  %v2029_v14 = vld [vmem:[%s3478_s2 + $0x158] sm:$0xff] }
 0x15a   : > { %2005 = vmatpush.xpose.msk.msrb.mxu2 %vm601_vm0, %v800_v13  ;;  %v2035_v13 = vld [vmem:[%s3479_s3 + $0x108] sm:$0xff] }
 0x1c1   : > { %v647_v7 = vpop.xlane.xlu0 %646 }
 0x1c2   : > { %v651_v8 = vsub.f32 %v642_v57, %v647_v7 }
 0x1c4   : > { %v653_v10 = vmul.f32 1.442695, %v651_v8 }
 0x1c6   : > { %2193 = vpow2.f32 %v653_v10  ;;  %v725_v10 = vld [vmem:[%s3481_s5 + $0x18] sm:$0xff] }
 0x1c7   : > { %1014 = vmatpush.msra.mxu0 %v725_v10  ;;  %v2031_v10 = vld [vmem:[%s3478_s2 + $0x168] sm:$0xff] }
 0x1c9   : > { %v650_v15 = vpop.xlane.xlu0 %649  ;;  %1015 = vmatpush.msra.mxu0 %v724_v11  ;;  %v2036_v11 = vld [vmem:[%s3479_s3 + $0x110] sm:$0xff] }
 0x1ca   : > { %v652_v16 = vsub.f32 %v643_v1, %v650_v15  ;;  %v722_v15 = vld [vmem:[%s3481_s5] sm:$0xff] }
 0x1cb   : > { %1016 = vmatpush.msra.mxu0 %v723_v12  ;;  %v2030_v12 = vld [vmem:[%s3478_s2 + $0x160] sm:$0xff] }
 0x1cc   : > { %v2639_v17 = vpop.eup %2193  ;;  %v655_v18 = vmul.f32 1.442695, %v652_v16 }
 0x1cd   : > { %v657_v19 = vsel %vm644_vm3, %v2639_v17, 0.0  ;;  %1017 = vmatpush.msra.mxu0 %v722_v15 }
 0x1ce   : > { %2195 = vpow2.f32 %v655_v18  ;;  %658 = vadd.xlane.f32.xlu1 %v657_v19 }
 0x1d4   : > { %v2643_v20 = vpop.eup %2195 }
 0x1d5   : > { %v660_v21 = vsel %vm644_vm3, %v2643_v20, 0.0 }
 0x1d6   : > { %661 = vadd.xlane.f32.xlu1 %v660_v21  ;;  %v2002_v21 = vld [vmem:[%s3480_s4 + $0xf0] sm:$0xff] }
 0x241   : > { %v659_v48 = vpop.xlane.xlu1 %658 }
 0x242   : > { %2197 = vrcp.f32 %v659_v48  ;;  %v674_v55 = vand.u32 2147483648, %v659_v48  ;;  %v672_v57 = vand.u32 2147483647, %v659_v48  ;;  %vm668_vm5 = vweird.f32 %v659_v48 }
 0x244   : > { %v675_v60 = vor.u32 1.1754944e-38, %v674_v55  ;;  %vm673_vm7 = vcmp.eq.f32.partialorder %v672_v57, 8.507059e+37 }
 0x248   : > { %v2198_v50 = vpop.eup %2197 }
 0x249   : > { %v664_v51 = vmul.f32 %v2198_v50, %v659_v48  ;;  %v662_v52 = vpop.xlane.xlu1 %661  ;;  %vm669_vm4 = vweird.f32 %v2198_v50 }
 0x24a   : > { %2199 = vrcp.f32 %v662_v52  ;;  %vm670_vm6 = vmor %vm668_vm5, %vm669_vm4  ;;  %v689_v2 = vand.u32 2147483648, %v662_v52  ;;  %v687_v4 = vand.u32 2147483647, %v662_v52  ;;  %vm683_vm9 = vweird.f32 %v662_v52 }
 0x24b   : > { %v665_v53 = vsub.f32 1.0, %v664_v51 }
 0x24c   : > { %v690_v6 = vor.u32 1.1754944e-38, %v689_v2  ;;  %vm688_vm11 = vcmp.eq.f32.partialorder %v687_v4, 8.507059e+37  ;;  %v2042_v2 = vld [vmem:[%s3479_s3 + $0x140] sm:$0xff]  ;;  %v2040_v4 = vld [vmem:[%s3479_s3 + $0x130] sm:$0xff] }
 0x24d   : > { %v666_v56 = vmul.f32 %v2198_v50, %v665_v53 }
 0x24f   : > { %v667_v58 = vadd.f32 %v2198_v50, %v666_v56 }
 0x250   : > { %v2200_v59 = vpop.eup %2199 }
 0x251   : > { %v679_v61 = vmul.f32 %v2200_v59, %v662_v52  ;;  %v671_v62 = vsel %vm670_vm6, %v2198_v50, %v667_v58  ;;  %vm684_vm8 = vweird.f32 %v2200_v59 }
 0x252   : > { %v676_v63 = vsel %vm673_vm7, %v675_v60, %v671_v62  ;;  %vm685_vm10 = vmor %vm683_vm9, %vm684_vm8  ;;  %v2048_v60 = vld [vmem:[%s3479_s3 + $0x170] sm:$0xff]  ;;  %v2046_v62 = vld [vmem:[%s3479_s3 + $0x160] sm:$0xff] }
 0x253   : > { %v680_v0 = vsub.f32 1.0, %v679_v61  ;;  %v677_v1 = vmul.f32 %v2639_v17, %v676_v63  ;;  %v2047_v61 = vld [vmem:[%s3479_s3 + $0x168] sm:$0xff]  ;;  %v2045_v63 = vld [vmem:[%s3479_s3 + $0x158] sm:$0xff] }
 0x255   : > { %v681_v3 = vmul.f32 %v2200_v59, %v680_v0  ;;  %1954 = vmatmul.msk.f32.vlgmr.msrb.gmra.mxu3 %vm644_vm3, %v677_v1  ;;  %v2044_v0 = vld [vmem:[%s3479_s3 + $0x150] sm:$0xff]  ;;  %v2043_v1 = vld [vmem:[%s3479_s3 + $0x148] sm:$0xff] }
 0x257   : > { %v682_v5 = vadd.f32 %v2200_v59, %v681_v3  ;;  %v2041_v3 = vld [vmem:[%s3479_s3 + $0x138] sm:$0xff] }
 0x259   : > { %v686_v7 = vsel %vm685_vm10, %v2200_v59, %v682_v5  ;;  %v2049_v59 = vld [vmem:[%s3479_s3 + $0x178] sm:$0xff] }
 0x25a   : > { %v691_v8 = vsel %vm688_vm11, %v690_v6, %v686_v7  ;;  %v2033_v5 = vld [vmem:[%s3478_s2 + $0x178] sm:$0xff]  ;;  %v2039_v6 = vld [vmem:[%s3479_s3 + $0x128] sm:$0xff]  ;;  %v2038_v7 = vld [vmem:[%s3479_s3 + $0x120] sm:$0xff] }
 0x25b   : > { %v692_v9 = vmul.f32 %v2643_v20, %v691_v8  ;;  %v2003_v20 = vld [vmem:[%s3480_s4 + $0xf8] sm:$0xff]  ;;  %v2032_v8 = vld [vmem:[%s3478_s2 + $0x170] sm:$0xff] }
 0x25c   : > { %823 = vmatpush.msrb.mxu1 %v2003_v20 }
 0x25d   : > { %1955 = vmatmul.msk.f32.gmra.mxu3 %vm644_vm3, %v692_v9  ;;  %v2037_v9 = vld [vmem:[%s3479_s3 + $0x118] sm:$0xff] }
 0x25e   : > { %824 = vmatpush.msrb.mxu1 %v2002_v21  ;;  %v2025_v21 = vld [vmem:[%s3478_s2 + $0x138] sm:$0xff] }
 0x260   : > { %825 = vmatpush.msrb.mxu1 %v2001_v22 }
 0x262   : > { %826 = vmatpush.msrb.mxu1 %v2000_v23 }
 0x264   : > { %827 = vmatpush.msrb.mxu1 %v1999_v24  ;;  %v2024_v24 = vld [vmem:[%s3478_s2 + $0x130] sm:$0xff] }
 0x265   : > { %759 = vmatmul.f32.vlgmr.msra.gmra.mxu3 %v2532_v31 }
 0x266   : > { %828 = vmatpush.msrb.mxu1 %v1998_v25 }
 0x268   : > { %829 = vmatpush.msrb.mxu1 %v1997_v26 }
 0x26a   : > { %830 = vmatpush.msrb.mxu1 %v1996_v27 }
 0x26c   : > { %831 = vmatpush.msrb.mxu1 %v1995_v28 }
 0x26d   : > { %762 = vmatmul.f32.gmra.mxu3 %v2540_v33 }
 0x26e   : > { %832 = vmatpush.msrb.mxu1 %v1994_v29  ;;  %v2023_v29 = vld [vmem:[%s3478_s2 + $0x128] sm:$0xff] }
 0x270   : > { %833 = vmatpush.msrb.mxu1 %v1993_v30  ;;  %v2022_v30 = vld [vmem:[%s3478_s2 + $0x120] sm:$0xff] }
 0x272   : > { %834 = vmatpush.msrb.mxu1 %v1992_v35  ;;  %v2012_v35 = vld [vmem:[%s3481_s5 + $0x30] sm:$0xff] }
 0x274   : > { %835 = vmatpush.msrb.mxu1 %v1991_v37 }
 0x276   : > { %836 = vmatpush.msrb.mxu1 %v1990_v39 }
 0x278   : > { %837 = vmatpush.msrb.mxu1 %v1989_v40 }
 0x27a   : > { %838 = vmatpush.msrb.mxu1 %v1988_v43  ;;  %v2020_v43 = vld [vmem:[%s3478_s2 + $0x110] sm:$0xff] }
 0x27b   : > { %839 = vmatmul.f32.vlgmr.msrb.gmra.mxu1 %v2532_v31 }
 0x27c   : > { %1042 = vmatpush.msra.mxu1 %v2033_v5  ;;  %v2061_v5 = vld [vmem:[%s3480_s4 + $0x158] sm:$0xff] }
 0x27e   : > { %1043 = vmatpush.msra.mxu1 %v2032_v8 }
 0x280   : > { %1044 = vmatpush.msra.mxu1 %v2031_v10  ;;  %v2057_v10 = vld [vmem:[%s3480_s4 + $0x138] sm:$0xff] }
 0x282   : > { %1045 = vmatpush.msra.mxu1 %v2030_v12  ;;  %v2055_v12 = vld [vmem:[%s3480_s4 + $0x128] sm:$0xff] }
 0x283   : > { %842 = vmatmul.f32.gmra.mxu1 %v2540_v33 }
 0x284   : > { %1046 = vmatpush.msra.mxu1 %v2029_v14 }
 0x2d8   : > { %v716_v16 = vpop.f32.mrf.mxu3 }
 0x2d9   : > { %2016 = vmatmul.msk.f32.vlgmr.msra.gmra.mxu0 %vm601_vm0, %v716_v16  ;;  %v2034_v16 = vld [vmem:[%s3479_s3 + $0x100] sm:$0xff] }
 0x2e0   : > { %v719_v17 = vpop.f32.mrf.mxu3 }
 0x2e1   : > { %2017 = vmatmul.msk.f32.gmra.mxu0 %vm601_vm0, %v719_v17  ;;  %v2028_v17 = vld [vmem:[%s3478_s2 + $0x150] sm:$0xff] }
 0x2e2   : > { %1047 = vmatpush.msra.mxu1 %v2028_v17  ;;  %v2053_v17 = vld [vmem:[%s3480_s4 + $0x118] sm:$0xff] }
 0x2e8   : > { %v760_v18 = vpop.f32.mrf.mxu3 }
 0x2e9   : > { %2006 = vmatmul.msk.f32.vlgmr.msrb.gmra.mxu2 %vm601_vm0, %v760_v18  ;;  %v2027_v18 = vld [vmem:[%s3478_s2 + $0x148] sm:$0xff] }
 0x2ea   : > { %1048 = vmatpush.msra.mxu1 %v2027_v18 }
 0x2f0   : > { %v763_v19 = vpop.f32.mrf.mxu3 }
 0x2f1   : > { %2007 = vmatmul.msk.f32.gmra.mxu2 %vm601_vm0, %v763_v19  ;;  %v2026_v19 = vld [vmem:[%s3478_s2 + $0x140] sm:$0xff] }
 0x2f2   : > { %1049 = vmatpush.msra.mxu1 %v2026_v19  ;;  %v2052_v19 = vld [vmem:[%s3480_s4 + $0x110] sm:$0xff] }
 0x2f4   : > { %1050 = vmatpush.msra.mxu1 %v2025_v21 }
 0x2f6   : > { %1051 = vmatpush.msra.mxu1 %v2024_v24 }
 0x2f8   : > { %v840_v55 = vpop.f32.mrf.mxu1  ;;  %1052 = vmatpush.msra.mxu1 %v2023_v29  ;;  %v2106_v29 = vld [vmem:[%s3479_s3 + $0x1e0] sm:$0xff] }
 0x2fa   : > { %1053 = vmatpush.msra.mxu1 %v2022_v30  ;;  %v2093_v30 = vld [vmem:[%s3478_s2 + $0x1f8] sm:$0xff] }
 0x300   : > { %v843_v58 = vpop.f32.mrf.mxu1 }
 0x301   : > { %953 = vmatpush.msra.mxu2 %v843_v58  ;;  %v2010_v58 = vld [vmem:[%s3481_s5 + $0x20] sm:$0xff] }
 0x303   : > { %954 = vmatpush.msra.mxu2 %v840_v55 }
 0x305   : > { %1082 = vmatpush.msrb.mxu2 %v2049_v59 }
 0x307   : > { %1083 = vmatpush.msrb.mxu2 %v2048_v60 }
 0x309   : > { %1084 = vmatpush.msrb.mxu2 %v2047_v61 }
 0x30b   : > { %1085 = vmatpush.msrb.mxu2 %v2046_v62 }
 0x30d   : > { %1086 = vmatpush.msrb.mxu2 %v2045_v63 }
 0x30f   : > { %1087 = vmatpush.msrb.mxu2 %v2044_v0  ;;  %v2065_v0 = vld [vmem:[%s3480_s4 + $0x178] sm:$0xff] }
 0x311   : > { %1088 = vmatpush.msrb.mxu2 %v2043_v1  ;;  %v2064_v1 = vld [vmem:[%s3480_s4 + $0x170] sm:$0xff] }
 0x313   : > { %1089 = vmatpush.msrb.mxu2 %v2042_v2 }
 0x315   : > { %1090 = vmatpush.msrb.mxu2 %v2041_v3  ;;  %v2063_v3 = vld [vmem:[%s3480_s4 + $0x168] sm:$0xff] }
 0x317   : > { %1091 = vmatpush.msrb.mxu2 %v2040_v4  ;;  %v2062_v4 = vld [vmem:[%s3480_s4 + $0x160] sm:$0xff] }
 0x319   : > { %1092 = vmatpush.msrb.mxu2 %v2039_v6  ;;  %v2060_v6 = vld [vmem:[%s3480_s4 + $0x150] sm:$0xff] }
 0x31b   : > { %1093 = vmatpush.msrb.mxu2 %v2038_v7  ;;  %v2059_v7 = vld [vmem:[%s3480_s4 + $0x148] sm:$0xff] }
 0x31d   : > { %1094 = vmatpush.msrb.mxu2 %v2037_v9  ;;  %v2058_v9 = vld [vmem:[%s3480_s4 + $0x140] sm:$0xff] }
 0x31f   : > { %1095 = vmatpush.msrb.mxu2 %v2036_v11  ;;  %v2056_v11 = vld [vmem:[%s3480_s4 + $0x130] sm:$0xff] }
 0x321   : > { %1096 = vmatpush.msrb.mxu2 %v2035_v13 }
 0x323   : > { %1097 = vmatpush.msrb.mxu2 %v2034_v16 }
 0x356   : > { %v2934_v2 = vpop.f32.mrf.mxu0 }
 0x35e   : > { %v2951_v8 = vpop.f32.mrf.mxu0 }
 0x36c   : > { %v875_v32 = vpop.f32.mrf.mxu2 }
 0x36d   : > { %v881_v34 = vmul.f32 0.17677669, %v875_v32 }
 0x36f   : > { %v883_v36 = vsel %vm2585_vm2, -1e+09, %v881_v34  ;;  %v2013_v34 = vld [vmem:[%s3481_s5 + $0x38] sm:$0xff] }
 0x370   : > { %v885_v38 = vsel %vm644_vm3, %v883_v36, -inf  ;;  %985 = vmatpush.msrb.mxu3 %v2013_v34  ;;  %v2104_v34 = vld [vmem:[%s3479_s3 + $0x1d0] sm:$0xff] }
 0x371   : > { %886 = vmax.xlane.f32.xlu2 %v885_v38  ;;  %v2021_v38 = vld [vmem:[%s3478_s2 + $0x118] sm:$0xff] }
 0x372   : > { %986 = vmatpush.msrb.mxu3 %v2012_v35  ;;  %1054 = vmatpush.msra.mxu1 %v2021_v38  ;;  %v2103_v35 = vld [vmem:[%s3479_s3 + $0x1c8] sm:$0xff]  ;;  %v2102_v38 = vld [vmem:[%s3479_s3 + $0x1c0] sm:$0xff] }
 0x374   : > { %v878_v41 = vpop.f32.mrf.mxu2  ;;  %1055 = vmatpush.msra.mxu1 %v2020_v43 }
 0x375   : > { %v882_v42 = vmul.f32 0.17677669, %v878_v41  ;;  %v2011_v41 = vld [vmem:[%s3481_s5 + $0x28] sm:$0xff] }
 0x376   : > { %987 = vmatpush.msrb.mxu3 %v2011_v41  ;;  %v2100_v41 = vld [vmem:[%s3479_s3 + $0x1b0] sm:$0xff] }
 0x377   : > { %v884_v44 = vsel %vm2585_vm2, -1e+09, %v882_v42 }
 0x378   : > { %v888_v45 = vsel %vm644_vm3, %v884_v44, -inf  ;;  %988 = vmatpush.msrb.mxu3 %v2010_v58 }
 0x379   : > { %889 = vmax.xlane.f32.xlu2 %v888_v45 }
 0x37a   : > { %1122 = vmatpush.msra.mxu3 %v2065_v0  ;;  %v2088_v0 = vld [vmem:[%s3478_s2 + $0x1d0] sm:$0xff] }
 0x37c   : > { %1123 = vmatpush.msra.mxu3 %v2064_v1  ;;  %v2086_v1 = vld [vmem:[%s3478_s2 + $0x1c0] sm:$0xff] }
 0x37e   : > { %1124 = vmatpush.msra.mxu3 %v2063_v3  ;;  %v2085_v3 = vld [vmem:[%s3478_s2 + $0x1b8] sm:$0xff] }
 0x380   : > { %1125 = vmatpush.msra.mxu3 %v2062_v4  ;;  %v2084_v4 = vld [vmem:[%s3478_s2 + $0x1b0] sm:$0xff] }
 0x382   : > { %1126 = vmatpush.msra.mxu3 %v2061_v5  ;;  %v2082_v5 = vld [vmem:[%s3478_s2 + $0x1a0] sm:$0xff] }
 0x384   : > { %1127 = vmatpush.msra.mxu3 %v2060_v6  ;;  %v2081_v6 = vld [vmem:[%s3478_s2 + $0x198] sm:$0xff] }
 0x386   : > { %1128 = vmatpush.msra.mxu3 %v2059_v7  ;;  %v2080_v7 = vld [vmem:[%s3478_s2 + $0x190] sm:$0xff] }
 0x388   : > { %1129 = vmatpush.msra.mxu3 %v2058_v9  ;;  %v2079_v9 = vld [vmem:[%s3478_s2 + $0x188] sm:$0xff] }
 0x38a   : > { %1130 = vmatpush.msra.mxu3 %v2057_v10  ;;  %v2078_v10 = vld [vmem:[%s3478_s2 + $0x180] sm:$0xff] }
 0x38c   : > { %1131 = vmatpush.msra.mxu3 %v2056_v11  ;;  %v3099_v11 = vld [vmem:[%s2520_s25] sm:$0xff] }
 0x38e   : > { %1132 = vmatpush.msra.mxu3 %v2055_v12 }
 0x3e4   : > { %v887_v46 = vpop.xlane.xlu2 %886 }
 0x3e5   : > { %v891_v47 = vsub.f32 %v883_v36, %v887_v46 }
 0x3e7   : > { %v893_v48 = vmul.f32 1.442695, %v891_v47  ;;  %v2019_v47 = vld [vmem:[%s3478_s2 + $0x108] sm:$0xff] }
 0x3e8   : > { %1056 = vmatpush.msra.mxu1 %v2019_v47 }
 0x3e9   : > { %2201 = vpow2.f32 %v893_v48 }
 0x3ec   : > { %v890_v49 = vpop.xlane.xlu2 %889 }
 0x3ed   : > { %v892_v50 = vsub.f32 %v884_v44, %v890_v49 }
 0x3ef   : > { %v2798_v51 = vpop.eup %2201  ;;  %v895_v52 = vmul.f32 1.442695, %v892_v50  ;;  %v2018_v50 = vld [vmem:[%s3478_s2 + $0x100] sm:$0xff] }
 0x3f0   : > { %v897_v53 = vsel %vm644_vm3, %v2798_v51, 0.0  ;;  %1057 = vmatpush.msra.mxu1 %v2018_v50  ;;  %v2096_v50 = vld [vmem:[%s3479_s3 + $0x190] sm:$0xff] }
 0x3f1   : > { %2203 = vpow2.f32 %v895_v52  ;;  %898 = vadd.xlane.f32.xlu0 %v897_v53  ;;  %1058 = vmatmul.f32.vlgmr.msra.gmra.mxu1 %v2532_v31 }
 0x3f7   : > { %v2802_v56 = vpop.eup %2203 }
 0x3f8   : > { %v900_v57 = vsel %vm644_vm3, %v2802_v56, 0.0 }
 0x3f9   : > { %901 = vadd.xlane.f32.xlu1 %v900_v57  ;;  %1061 = vmatmul.f32.gmra.mxu1 %v2540_v33 }
 0x464   : > { %v899_v15 = vpop.xlane.xlu0 %898 }
 0x465   : > { %2205 = vrcp.f32 %v899_v15  ;;  %v914_v26 = vand.u32 2147483648, %v899_v15  ;;  %v912_v28 = vand.u32 2147483647, %v899_v15  ;;  %vm908_vm13 = vweird.f32 %v899_v15 }
 0x467   : > { %v915_v37 = vor.u32 1.1754944e-38, %v914_v26  ;;  %vm913_vm15 = vcmp.eq.f32.partialorder %v912_v28, 8.507059e+37  ;;  %v2109_v26 = vld [vmem:[%s3479_s3 + $0x1f8] sm:$0xff]  ;;  %v2107_v28 = vld [vmem:[%s3479_s3 + $0x1e8] sm:$0xff] }
 0x46b   : > { %v2206_v20 = vpop.eup %2205 }
 0x46c   : > { %v904_v22 = vmul.f32 %v2206_v20, %v899_v15  ;;  %v902_v23 = vpop.xlane.xlu1 %901  ;;  %vm909_vm12 = vweird.f32 %v2206_v20  ;;  %v2054_v15 = vld [vmem:[%s3480_s4 + $0x120] sm:$0xff] }
 0x46d   : > { %2207 = vrcp.f32 %v902_v23  ;;  %vm910_vm14 = vmor %vm908_vm13, %vm909_vm12  ;;  %v929_v46 = vand.u32 2147483648, %v902_v23  ;;  %v927_v49 = vand.u32 2147483647, %v902_v23  ;;  %vm923_vm4 = vweird.f32 %v902_v23  ;;  %1133 = vmatpush.msra.mxu3 %v2054_v15 }
 0x46e   : > { %v905_v25 = vsub.f32 1.0, %v904_v22  ;;  %v1059_v62 = vpop.f32.mrf.mxu1 }
 0x46f   : > { %vm928_vm6 = vcmp.eq.f32.partialorder %v927_v49, 8.507059e+37  ;;  %1134 = vmatpush.msra.mxu3 %v2053_v17 }
 0x470   : > { %v906_v27 = vmul.f32 %v2206_v20, %v905_v25 }
 0x471   : > { %1135 = vmatpush.msra.mxu3 %v2052_v19 }
 0x472   : > { %v907_v32 = vadd.f32 %v2206_v20, %v906_v27  ;;  %v2108_v27 = vld [vmem:[%s3479_s3 + $0x1f0] sm:$0xff] }
 0x473   : > { %v2208_v36 = vpop.eup %2207 }
 0x474   : > { %v911_v39 = vsel %vm910_vm14, %v2206_v20, %v907_v32  ;;  %v919_v40 = vmul.f32 %v2208_v36, %v902_v23  ;;  %vm924_vm1 = vweird.f32 %v2208_v36  ;;  %v2051_v20 = vld [vmem:[%s3480_s4 + $0x108] sm:$0xff]  ;;  %v2050_v23 = vld [vmem:[%s3480_s4 + $0x100] sm:$0xff]  ;;  %v2105_v32 = vld [vmem:[%s3479_s3 + $0x1d8] sm:$0xff] }
 0x475   : > { %v916_v42 = vsel %vm913_vm15, %v915_v37, %v911_v39  ;;  %vm925_vm5 = vmor %vm923_vm4, %vm924_vm1  ;;  %1136 = vmatpush.msra.mxu3 %v2051_v20 }
 0x476   : > { %v920_v44 = vsub.f32 1.0, %v919_v40  ;;  %v917_v45 = vmul.f32 %v2798_v51, %v916_v42  ;;  %v930_v51 = vor.u32 1.1754944e-38, %v929_v46  ;;  %v1062_v63 = vpop.f32.mrf.mxu1  ;;  %v2101_v40 = vld [vmem:[%s3479_s3 + $0x1b8] sm:$0xff]  ;;  %v2099_v42 = vld [vmem:[%s3479_s3 + $0x1a8] sm:$0xff] }
 0x477   : > { %1137 = vmatpush.msra.mxu3 %v2050_v23 }
 0x478   : > { %v921_v48 = vmul.f32 %v2208_v36, %v920_v44  ;;  %2008 = vmatmul.msk.f32.vlgmr.msra.gmra.mxu2 %vm644_vm3, %v917_v45  ;;  %v2098_v45 = vld [vmem:[%s3479_s3 + $0x1a0] sm:$0xff] }
 0x479   : > { %1314 = vmatpush.msra.mxu2 %v2093_v30 }
 0x47a   : > { %v922_v52 = vadd.f32 %v2208_v36, %v921_v48  ;;  %v2097_v48 = vld [vmem:[%s3479_s3 + $0x198] sm:$0xff] }
 0x47c   : > { %v926_v53 = vsel %vm925_vm5, %v2208_v36, %v922_v52  ;;  %v2095_v52 = vld [vmem:[%s3479_s3 + $0x188] sm:$0xff] }
 0x47d   : > { %v931_v55 = vsel %vm928_vm6, %v930_v51, %v926_v53 }
 0x47e   : > { %v932_v57 = vmul.f32 %v2802_v56, %v931_v55 }
 0x480   : > { %2009 = vmatmul.msk.f32.gmra.mxu2 %vm644_vm3, %v932_v57 }
 0x488   : > { %1098 = vmatmul.f32.vlgmr.msrb.gmra.mxu2 %v2532_v31 }
 0x490   : > { %1101 = vmatmul.f32.gmra.mxu2 %v2540_v33 }
 0x4fb   : > { %v956_v59 = vpop.f32.mrf.mxu2 }
 0x4fc   : > { %2014 = vmatmul.msk.f32.vlgmr.msrb.gmra.mxu3 %vm601_vm0, %v956_v59  ;;  %v2092_v59 = vld [vmem:[%s3478_s2 + $0x1f0] sm:$0xff] }
 0x4fd   : > { %1354 = vmatpush.msrb.mxu3 %v2109_v26  ;;  %1315 = vmatpush.msra.mxu2 %v2092_v59  ;;  %v2122_v59 = vld [vmem:[%s3480_s4 + $0x1e0] sm:$0xff] }
 0x4ff   : > { %1355 = vmatpush.msrb.mxu3 %v2108_v27 }
 0x501   : > { %1356 = vmatpush.msrb.mxu3 %v2107_v28 }
 0x503   : > { %v959_v60 = vpop.f32.mrf.mxu2  ;;  %1357 = vmatpush.msrb.mxu3 %v2106_v29 }
 0x504   : > { %2015 = vmatmul.msk.f32.gmra.mxu3 %vm601_vm0, %v959_v60  ;;  %v2094_v60 = vld [vmem:[%s3479_s3 + $0x180] sm:$0xff] }
 0x505   : > { %1358 = vmatpush.msrb.mxu3 %v2105_v32 }
 0x507   : > { %1359 = vmatpush.msrb.mxu3 %v2104_v34 }
 0x509   : > { %1360 = vmatpush.msrb.mxu3 %v2103_v35 }
 0x50b   : > { %v1099_v56 = vpop.f32.mrf.mxu2  ;;  %1361 = vmatpush.msrb.mxu3 %v2102_v38 }
 0x50c   : > { %1138 = vmatmul.f32.vlgmr.msra.gmra.mxu3 %v2532_v31 }
 0x50d   : > { %1362 = vmatpush.msrb.mxu3 %v2101_v40  ;;  %v2074_v40 = vld [vmem:[%s3481_s5 + $0x50] sm:$0xff] }
 0x50f   : > { %1363 = vmatpush.msrb.mxu3 %v2100_v41  ;;  %v2073_v41 = vld [vmem:[%s3481_s5 + $0x48] sm:$0xff] }
 0x511   : > { %1364 = vmatpush.msrb.mxu3 %v2099_v42  ;;  %v2072_v42 = vld [vmem:[%s3481_s5 + $0x40] sm:$0xff] }
 0x513   : > { %v1102_v61 = vpop.f32.mrf.mxu2  ;;  %1365 = vmatpush.msrb.mxu3 %v2098_v45 }
 0x514   : > { %2066 = vmatpush.xpose.msk.msrb.mxu0 %vm601_vm0, %v1102_v61  ;;  %1141 = vmatmul.f32.gmra.mxu3 %v2540_v33  ;;  %v2090_v61 = vld [vmem:[%s3478_s2 + $0x1e0] sm:$0xff] }
 0x515   : > { %1366 = vmatpush.msrb.mxu3 %v2097_v48 }
 0x517   : > { %1367 = vmatpush.msrb.mxu3 %v2096_v50  ;;  %v2124_v50 = vld [vmem:[%s3480_s4 + $0x1f0] sm:$0xff] }
 0x518   : > { %2067 = vmatpush.xpose.msk.msrb.mxu0 %vm601_vm0, %v1099_v56  ;;  %v2091_v56 = vld [vmem:[%s3478_s2 + $0x1e8] sm:$0xff] }
 0x519   : > { %1368 = vmatpush.msrb.mxu3 %v2095_v52  ;;  %1316 = vmatpush.msra.mxu2 %v2091_v56  ;;  %v2119_v56 = vld [vmem:[%s3480_s4 + $0x1c8] sm:$0xff] }
 0x51b   : > { %2068 = vmatmul.msk.f32.vlgmr.msrb.gmra.mxu0 %vm601_vm0, %v1059_v62  ;;  %1369 = vmatpush.msrb.mxu3 %v2094_v60  ;;  %v2121_v60 = vld [vmem:[%s3480_s4 + $0x1d8] sm:$0xff] }
 0x51c   : > { %1370 = vmatmul.f32.vlgmr.msrb.gmra.mxu3 %v2532_v31  ;;  %1317 = vmatpush.msra.mxu2 %v2090_v61  ;;  %v2087_v31 = vld [vmem:[%s3478_s2 + $0x1c8] sm:$0xff] }
 0x523   : > { %2069 = vmatmul.msk.f32.gmra.mxu0 %vm601_vm0, %v1062_v63  ;;  %v2089_v63 = vld [vmem:[%s3478_s2 + $0x1d8] sm:$0xff] }
 0x524   : > { %1318 = vmatpush.msra.mxu2 %v2089_v63  ;;  %1373 = vmatmul.f32.gmra.mxu3 %v2540_v33  ;;  %v2083_v33 = vld [vmem:[%s3478_s2 + $0x1a8] sm:$0xff]  ;;  %v2118_v63 = vld [vmem:[%s3480_s4 + $0x1c0] sm:$0xff] }
 0x526   : > { %1319 = vmatpush.msra.mxu2 %v2088_v0  ;;  %v2117_v0 = vld [vmem:[%s3480_s4 + $0x1b8] sm:$0xff] }
 0x528   : > { %1320 = vmatpush.msra.mxu2 %v2087_v31 }
 0x52a   : > { %1321 = vmatpush.msra.mxu2 %v2086_v1 }
 0x52c   : > { %1322 = vmatpush.msra.mxu2 %v2085_v3  ;;  %v2114_v3 = vld [vmem:[%s3480_s4 + $0x1a0] sm:$0xff] }
 0x52e   : > { %1323 = vmatpush.msra.mxu2 %v2084_v4 }
 0x530   : > { %1324 = vmatpush.msra.mxu2 %v2083_v33  ;;  %v2113_v33 = vld [vmem:[%s3480_s4 + $0x198] sm:$0xff] }
 0x532   : > { %1325 = vmatpush.msra.mxu2 %v2082_v5 }
 0x534   : > { %1326 = vmatpush.msra.mxu2 %v2081_v6  ;;  %v2112_v6 = vld [vmem:[%s3480_s4 + $0x190] sm:$0xff] }
 0x536   : > { %1327 = vmatpush.msra.mxu2 %v2080_v7  ;;  %v2111_v7 = vld [vmem:[%s3480_s4 + $0x188] sm:$0xff] }
 0x538   : > { %1328 = vmatpush.msra.mxu2 %v2079_v9 }
 0x53a   : > { %1329 = vmatpush.msra.mxu2 %v2078_v10 }
 0x53b   : > { %1330 = vmatmul.f32.vlgmr.msra.gmra.mxu2 %v3099_v11 }
 0x57f   : > { %v3044_v55 = vpop.f32.mrf.mxu3 }
 0x580   : > { %v1020_v52 = vadd.f32 %v2934_v2, %v3044_v55  ;;  %v2120_v2 = vld [vmem:[%s3480_s4 + $0x1d0] sm:$0xff] }
 0x587   : > { %v3046_v57 = vpop.f32.mrf.mxu3 }
 0x588   : > { %v1023_v55 = vadd.f32 %v2951_v8, %v3046_v57  ;;  %v2116_v8 = vld [vmem:[%s3480_s4 + $0x1b0] sm:$0xff]  ;;  %v2115_v57 = vld [vmem:[%s3480_s4 + $0x1a8] sm:$0xff] }
 0x58f   : > { %v1139_v58 = vpop.f32.mrf.mxu3 }
 0x597   : > { %v1142_v62 = vpop.f32.mrf.mxu3 }
 0x598   : > { %v1174_v13 = vpop.f32.mrf.mxu0  ;;  %1252 = vmatpush.msra.mxu0 %v1142_v62 }
 0x599   : > { %v1180_v14 = vmul.f32 0.17677669, %v1174_v13  ;;  %v3103_v13 = vld [vmem:[%s2520_s25 + $0x8] sm:$0xff]  ;;  %s1869_s25 = sshll.u32 %s471_s28, 4  ;;  %s1870_s25 = int_to_ptr.vmem [resolvable:$true] %s1869_s25 }
 0x59a   : > { %1253 = vmatpush.msra.mxu0 %v1139_v58  ;;  %1333 = vmatmul.f32.gmra.mxu2 %v3103_v13 }
 0x59b   : > { %v1182_v16 = vsel %vm2585_vm2, -1e+09, %v1180_v14 }
 0x59c   : > { %v1184_v18 = vsel %vm644_vm3, %v1182_v16, -inf }
 0x59d   : > { %1185 = vmax.xlane.f32.xlu2 %v1184_v18 }
 0x5a0   : > { %v1177_v21 = vpop.f32.mrf.mxu0 }
 0x5a1   : > { %v1181_v22 = vmul.f32 0.17677669, %v1177_v21 }
 0x5a3   : > { %v1183_v24 = vsel %vm2585_vm2, -1e+09, %v1181_v22 }
 0x5a4   : > { %v1187_v25 = vsel %vm644_vm3, %v1183_v24, -inf }
 0x5a5   : > { %1188 = vmax.xlane.f32.xlu0 %v1187_v25 }
 0x610   : > { %v1186_v36 = vpop.xlane.xlu2 %1185 }
 0x611   : > { %v1190_v37 = vsub.f32 %v1182_v16, %v1186_v36 }
 0x613   : > { %v1192_v39 = vmul.f32 1.442695, %v1190_v37 }
 0x615   : > { %2209 = vpow2.f32 %v1192_v39  ;;  %v2075_v39 = vld [vmem:[%s3481_s5 + $0x58] sm:$0xff] }
 0x616   : > { %1284 = vmatpush.msrb.mxu1 %v2075_v39 }
 0x618   : > { %v1189_v43 = vpop.xlane.xlu0 %1188  ;;  %1285 = vmatpush.msrb.mxu1 %v2074_v40 }
 0x619   : > { %v1191_v44 = vsub.f32 %v1183_v24, %v1189_v43  ;;  %v1371_v43 = vpop.f32.mrf.mxu3 }
 0x61a   : > { %1286 = vmatpush.msrb.mxu1 %v2073_v41 }
 0x61b   : > { %v3027_v46 = vpop.eup %2209  ;;  %v1194_v47 = vmul.f32 1.442695, %v1191_v44 }
 0x61c   : > { %v1196_v49 = vsel %vm644_vm3, %v3027_v46, 0.0  ;;  %1287 = vmatpush.msrb.mxu1 %v2072_v42 }
 0x61d   : > { %2211 = vpow2.f32 %v1194_v47  ;;  %1197 = vadd.xlane.f32.xlu1 %v1196_v49  ;;  %v1331_v47 = vpop.f32.mrf.mxu2  ;;  %v2125_v49 = vld [vmem:[%s3480_s4 + $0x1f8] sm:$0xff] }
 0x61e   : > { %1394 = vmatpush.msrb.mxu0 %v2125_v49 }
 0x620   : > { %1395 = vmatpush.msrb.mxu0 %v2124_v50 }
 0x621   : > { %v1374_v44 = vpop.f32.mrf.mxu3 }
 0x622   : > { %2126 = vmatpush.xpose.msk.msra.mxu1 %vm601_vm0, %v1374_v44 }
 0x623   : > { %v3040_v51 = vpop.eup %2211 }
 0x624   : > { %v1199_v53 = vsel %vm644_vm3, %v3040_v51, 0.0 }
 0x625   : > { %1200 = vadd.xlane.f32.xlu2 %v1199_v53  ;;  %v1334_v48 = vpop.f32.mrf.mxu2 }
 0x626   : > { %2127 = vmatpush.xpose.msk.msra.mxu1 %vm601_vm0, %v1371_v43 }
 0x690   : > { %v1198_v12 = vpop.xlane.xlu1 %1197 }
 0x691   : > { %2213 = vrcp.f32 %v1198_v12  ;;  %v1213_v18 = vand.u32 2147483648, %v1198_v12  ;;  %v1211_v20 = vand.u32 2147483647, %v1198_v12  ;;  %vm1207_vm8 = vweird.f32 %v1198_v12 }
 0x693   : > { %v1214_v23 = vor.u32 1.1754944e-38, %v1213_v18  ;;  %vm1212_vm10 = vcmp.eq.f32.partialorder %v1211_v20, 8.507059e+37 }
 0x697   : > { %v2214_v14 = vpop.eup %2213 }
 0x698   : > { %v1203_v15 = vmul.f32 %v2214_v14, %v1198_v12  ;;  %v1201_v16 = vpop.xlane.xlu2 %1200  ;;  %vm1208_vm7 = vweird.f32 %v2214_v14  ;;  %v2110_v12 = vld [vmem:[%s3480_s4 + $0x180] sm:$0xff] }
 0x699   : > { %2215 = vrcp.f32 %v1201_v16  ;;  %vm1209_vm9 = vmor %vm1207_vm8, %vm1208_vm7  ;;  %v1228_v29 = vand.u32 2147483648, %v1201_v16  ;;  %v1226_v32 = vand.u32 2147483647, %v1201_v16  ;;  %vm1222_vm12 = vweird.f32 %v1201_v16 }
 0x69a   : > { %v1204_v17 = vsub.f32 1.0, %v1203_v15 }
 0x69b   : > { %v1229_v35 = vor.u32 1.1754944e-38, %v1228_v29  ;;  %vm1227_vm14 = vcmp.eq.f32.partialorder %v1226_v32, 8.507059e+37  ;;  %v2133_v29 = vld [vmem:[%s3481_s5 + $0x68] sm:$0xff] }
 0x69c   : > { %v1205_v19 = vmul.f32 %v2214_v14, %v1204_v17 }
 0x69e   : > { %v1206_v21 = vadd.f32 %v2214_v14, %v1205_v19 }
 0x69f   : > { %v2216_v22 = vpop.eup %2215 }
 0x6a0   : > { %v1210_v24 = vsel %vm1209_vm9, %v2214_v14, %v1206_v21  ;;  %v1218_v25 = vmul.f32 %v2216_v22, %v1201_v16  ;;  %vm1223_vm11 = vweird.f32 %v2216_v22 }
 0x6a1   : > { %v1215_v26 = vsel %vm1212_vm10, %v1214_v23, %v1210_v24  ;;  %vm1224_vm13 = vmor %vm1222_vm12, %vm1223_vm11 }
 0x6a2   : > { %v1219_v27 = vsub.f32 1.0, %v1218_v25  ;;  %v1216_v28 = vmul.f32 %v3027_v46, %v1215_v26 }
 0x6a4   : > { %v1220_v30 = vmul.f32 %v2216_v22, %v1219_v27  ;;  %2070 = vmatmul.msk.f32.vlgmr.msra.gmra.mxu0 %vm644_vm3, %v1216_v28  ;;  %v2135_v27 = vld [vmem:[%s3481_s5 + $0x78] sm:$0xff]  ;;  %v2134_v28 = vld [vmem:[%s3481_s5 + $0x70] sm:$0xff] }
 0x6a5   : > { %1556 = vmatpush.msrb.mxu2 %v2135_v27  ;;  %v1649_v27 = vld [vmem:[%s3484_s8 + $0x98] sm:$0xff] }
 0x6a6   : > { %v1221_v34 = vadd.f32 %v2216_v22, %v1220_v30 }
 0x6a7   : > { %1557 = vmatpush.msrb.mxu2 %v2134_v28  ;;  %v1646_v28 = vld [vmem:[%s3484_s8 + $0x80] sm:$0xff] }
 0x6a8   : > { %v1225_v36 = vsel %vm1224_vm13, %v2216_v22, %v1221_v34 }
 0x6a9   : > { %v1230_v37 = vsel %vm1227_vm14, %v1229_v35, %v1225_v36  ;;  %1558 = vmatpush.msrb.mxu2 %v2133_v29  ;;  %v1647_v29 = vld [vmem:[%s3484_s8 + $0x88] sm:$0xff] }
 0x6aa   : > { %v1231_v38 = vmul.f32 %v3040_v51, %v1230_v37  ;;  %v2123_v51 = vld [vmem:[%s3480_s4 + $0x1e8] sm:$0xff] }
 0x6ab   : > { %1396 = vmatpush.msrb.mxu0 %v2123_v51 }
 0x6ac   : > { %2071 = vmatmul.msk.f32.gmra.mxu0 %vm644_vm3, %v1231_v38 }
 0x6ad   : > { %1397 = vmatpush.msrb.mxu0 %v2122_v59 }
 0x6af   : > { %1398 = vmatpush.msrb.mxu0 %v2121_v60 }
 0x6b1   : > { %1399 = vmatpush.msrb.mxu0 %v2120_v2  ;;  %v2132_v2 = vld [vmem:[%s3481_s5 + $0x60] sm:$0xff] }
 0x6b2   : > { %1559 = vmatpush.msrb.mxu2 %v2132_v2 }
 0x6b3   : > { %1400 = vmatpush.msrb.mxu0 %v2119_v56 }
 0x6b5   : > { %1401 = vmatpush.msrb.mxu0 %v2118_v63 }
 0x6b7   : > { %1402 = vmatpush.msrb.mxu0 %v2117_v0 }
 0x6b9   : > { %1403 = vmatpush.msrb.mxu0 %v2116_v8 }
 0x6bb   : > { %1404 = vmatpush.msrb.mxu0 %v2115_v57 }
 0x6bd   : > { %1405 = vmatpush.msrb.mxu0 %v2114_v3 }
 0x6bf   : > { %1406 = vmatpush.msrb.mxu0 %v2113_v33  ;;  %v1660_v33 = vld [vmem:[%s3484_s8 + $0xf0] sm:$0xff] }
 0x6c0   : > { %1668 = vmatpush.msra.mxu3 %v1660_v33  ;;  %v1728_v33 = vld [vmem:[%s3486_s10 + $0x50] sm:$0xff] }
 0x6c1   : > { %1407 = vmatpush.msrb.mxu0 %v2112_v6 }
 0x6c3   : > { %1408 = vmatpush.msrb.mxu0 %v2111_v7 }
 0x6c5   : > { %1409 = vmatpush.msrb.mxu0 %v2110_v12 }
 0x6c6   : > { %1410 = vmatmul.f32.vlgmr.msrb.gmra.mxu0 %v3099_v11 }
 0x6ce   : > { %1413 = vmatmul.f32.gmra.mxu0 %v3103_v13 }
 0x721   : > { %v1255_v45 = vpop.f32.mrf.mxu0 }
 0x722   : > { %2076 = vmatmul.msk.f32.vlgmr.msrb.gmra.mxu1 %vm601_vm0, %v1255_v45 }
 0x729   : > { %v1258_v46 = vpop.f32.mrf.mxu0 }
 0x72a   : > { %2077 = vmatmul.msk.f32.gmra.mxu1 %vm601_vm0, %v1258_v46 }
 0x732   : > { %2128 = vmatmul.msk.f32.vlgmr.msra.gmra.mxu1 %vm601_vm0, %v1331_v47 }
 0x73a   : > { %2129 = vmatmul.msk.f32.gmra.mxu1 %vm601_vm0, %v1334_v48 }
 0x743   : > { %v1411_v25 = vpop.f32.mrf.mxu0 }
 0x74b   : > { %v1414_v26 = vpop.f32.mrf.mxu0 }
 0x74c   : > { %1524 = vmatpush.msrb.mxu1 %v1414_v26  ;;  %v1648_v26 = vld [vmem:[%s3484_s8 + $0x90] sm:$0xff] }
 0x74e   : > { %1525 = vmatpush.msrb.mxu1 %v1411_v25  ;;  %v1651_v25 = vld [vmem:[%s3484_s8 + $0xa8] sm:$0xff] }
 0x79f   : > { %v1289_v53 = vpop.f32.mrf.mxu1 }
 0x7a0   : > { %v3139_v58 = vadd.f32 %v1289_v53, %v1020_v52 }
 0x7a7   : > { %v1292_v61 = vpop.f32.mrf.mxu1 }
 0x7a8   : > { %v3155_v62 = vadd.f32 %v1292_v61, %v1023_v55 }
 0x7af   : > { %v1446_v31 = vpop.f32.mrf.mxu1 }
 0x7b0   : > { %v1452_v1 = vmul.f32 0.17677669, %v1446_v31 }
 0x7b2   : > { %v1454_v4 = vsel %vm2585_vm2, -1e+09, %v1452_v1  ;;  %v2302_v1 = vmov 128.0  }
 0x7b3   : > { %v1456_v5 = vsel %vm644_vm3, %v1454_v4, -inf }
 0x7b4   : > { %1457 = vmax.xlane.f32.xlu0 %v1456_v5 }
 0x7b7   : > { %v1449_v9 = vpop.f32.mrf.mxu1 }
 0x7b8   : > { %v1453_v10 = vmul.f32 0.17677669, %v1449_v9 }
 0x7ba   : > { %v1455_v14 = vsel %vm2585_vm2, -1e+09, %v1453_v10 }
 0x7bb   : > { %v1459_v15 = vsel %vm644_vm3, %v1455_v14, -inf }
 0x7bc   : > { %1460 = vmax.xlane.f32.xlu1 %v1459_v15 }
 0x827   : > { %v1458_v16 = vpop.xlane.xlu0 %1457 }
 0x828   : > { %v1462_v17 = vsub.f32 %v1454_v4, %v1458_v16 }
 0x82a   : > { %v1464_v18 = vmul.f32 1.442695, %v1462_v17 }
 0x82c   : > { %2217 = vpow2.f32 %v1464_v18 }
 0x82f   : > { %v1461_v19 = vpop.xlane.xlu1 %1460 }
 0x830   : > { %v1463_v20 = vsub.f32 %v1455_v14, %v1461_v19  ;;  %v1656_v19 = vld [vmem:[%s3484_s8 + $0xd0] sm:$0xff] }
 0x832   : > { %v2218_v21 = vpop.eup %2217  ;;  %v1466_v22 = vmul.f32 1.442695, %v1463_v20  ;;  %v1657_v20 = vld [vmem:[%s3484_s8 + $0xd8] sm:$0xff] }
 0x833   : > { %v1468_v23 = vsel %vm644_vm3, %v2218_v21, 0.0 }
 0x834   : > { %2219 = vpow2.f32 %v1466_v22  ;;  %1469 = vadd.xlane.f32.xlu2 %v1468_v23  ;;  %v1655_v22 = vld [vmem:[%s3484_s8 + $0xc8] sm:$0xff]  ;;  %v1652_v23 = vld [vmem:[%s3484_s8 + $0xb0] sm:$0xff] }
 0x83a   : > { %v2220_v54 = vpop.eup %2219 }
 0x83b   : > { %v1471_v24 = vsel %vm644_vm3, %v2220_v54, 0.0 }
 0x83c   : > { %1472 = vadd.xlane.f32.xlu0 %v1471_v24  ;;  %v1650_v24 = vld [vmem:[%s3484_s8 + $0xa0] sm:$0xff] }
 0x8a7   : > { %v1470_v30 = vpop.xlane.xlu2 %1469 }
 0x8a8   : > { %2221 = vrcp.f32 %v1470_v30  ;;  %v1485_v37 = vand.u32 2147483648, %v1470_v30  ;;  %v1483_v39 = vand.u32 2147483647, %v1470_v30  ;;  %vm1479_vm15 = vweird.f32 %v1470_v30 }
 0x8aa   : > { %v1486_v42 = vor.u32 1.1754944e-38, %v1485_v37  ;;  %vm1484_vm4 = vcmp.eq.f32.partialorder %v1483_v39, 8.507059e+37  ;;  %v1641_v37 = vld [vmem:[%s3484_s8 + $0x58] sm:$0xff]  ;;  %v1639_v39 = vld [vmem:[%s3484_s8 + $0x48] sm:$0xff] }
 0x8ae   : > { %v2222_v32 = vpop.eup %2221 }
 0x8af   : > { %v1475_v34 = vmul.f32 %v2222_v32, %v1470_v30  ;;  %v1473_v35 = vpop.xlane.xlu0 %1472  ;;  %vm1480_vm2 = vweird.f32 %v2222_v32  ;;  %v1644_v30 = vld [vmem:[%s3484_s8 + $0x70] sm:$0xff] }
 0x8b0   : > { %2223 = vrcp.f32 %v1473_v35  ;;  %vm1481_vm1 = vmor %vm1479_vm15, %vm1480_vm2  ;;  %v1500_v48 = vand.u32 2147483648, %v1473_v35  ;;  %v1498_v50 = vand.u32 2147483647, %v1473_v35  ;;  %vm1494_vm6 = vweird.f32 %v1473_v35 }
 0x8b1   : > { %v1476_v36 = vsub.f32 1.0, %v1475_v34  ;;  %2225 = vrcp.f32 %v2302_v1  ;;  %v1642_v34 = vld [vmem:[%s3484_s8 + $0x60] sm:$0xff]  ;;  %v1729_v1 = vld [vmem:[%s3486_s10 + $0x58] sm:$0xff] }
 0x8b2   : > { %v1501_v51 = vor.u32 1.1754944e-38, %v1500_v48  ;;  %vm1499_vm8 = vcmp.eq.f32.partialorder %v1498_v50, 8.507059e+37 }
 0x8b3   : > { %v1477_v38 = vmul.f32 %v2222_v32, %v1476_v36  ;;  %v1640_v36 = vld [vmem:[%s3484_s8 + $0x50] sm:$0xff] }
 0x8b5   : > { %v1478_v40 = vadd.f32 %v2222_v32, %v1477_v38  ;;  %v1638_v38 = vld [vmem:[%s3484_s8 + $0x40] sm:$0xff] }
 0x8b6   : > { %v2224_v41 = vpop.eup %2223 }
 0x8b7   : > { %v1482_v43 = vsel %vm1481_vm1, %v2222_v32, %v1478_v40  ;;  %v1490_v44 = vmul.f32 %v2224_v41, %v1473_v35  ;;  %vm1495_vm5 = vweird.f32 %v2224_v41  ;;  %v2226_v3 = vpop.eup %2225  ;;  %v1645_v32 = vld [vmem:[%s3484_s8 + $0x78] sm:$0xff]  ;;  %v1643_v35 = vld [vmem:[%s3484_s8 + $0x68] sm:$0xff]  ;;  %v1636_v40 = vld [vmem:[%s3484_s8 + $0x30] sm:$0xff] }
 0x8b8   : > { %v1487_v45 = vsel %vm1484_vm4, %v1486_v42, %v1482_v43  ;;  %vm1496_vm7 = vmor %vm1494_vm6, %vm1495_vm5  ;;  %v1578_v4 = vmul.f32 128.0, %v2226_v3  ;;  %v1634_v42 = vld [vmem:[%s3484_s8 + $0x20] sm:$0xff]  ;;  %v1635_v43 = vld [vmem:[%s3484_s8 + $0x28] sm:$0xff] }
 0x8b9   : > { %v1491_v46 = vsub.f32 1.0, %v1490_v44  ;;  %v1488_v47 = vmul.f32 %v2218_v21, %v1487_v45  ;;  %v1654_v21 = vld [vmem:[%s3484_s8 + $0xc0] sm:$0xff]  ;;  %v1632_v44 = vld [vmem:[%s3484_s8 + $0x10] sm:$0xff]  ;;  %v1633_v45 = vld [vmem:[%s3484_s8 + $0x18] sm:$0xff] }
 0x8bb   : > { %v1492_v49 = vmul.f32 %v2224_v41, %v1491_v46  ;;  %2130 = vmatmul.msk.f32.vlgmr.msrb.gmra.mxu1 %vm644_vm3, %v1488_v47  ;;  %v1630_v46 = vld [vmem:[%s3484_s8] sm:$0xff]  ;;  %v1631_v47 = vld [vmem:[%s3484_s8 + $0x8] sm:$0xff] }
 0x8bd   : > { %v1493_v52 = vadd.f32 %v2224_v41, %v1492_v49 }
 0x8bf   : > { %v1497_v53 = vsel %vm1496_vm7, %v2224_v41, %v1493_v52  ;;  %v1637_v41 = vld [vmem:[%s3484_s8 + $0x38] sm:$0xff] }
 0x8c0   : > { %v1502_v59 = vsel %vm1499_vm8, %v1501_v51, %v1497_v53  ;;  %v1749_v52 = vld [vmem:[%s3486_s10 + $0xf8] sm:$0xff]  ;;  %v1748_v51 = vld [vmem:[%s3486_s10 + $0xf0] sm:$0xff] }
 0x8c1   : > { %v1503_v60 = vmul.f32 %v2220_v54, %v1502_v59  ;;  %v1653_v54 = vld [vmem:[%s3484_s8 + $0xb8] sm:$0xff]  ;;  %1777 = vmatpush.msra.mxu2 %v1749_v52  ;;  %v1732_v59 = vld [vmem:[%s3486_s10 + $0x70] sm:$0xff] }
 0x8c2   : > { %v1733_v53 = vld [vmem:[%s3486_s10 + $0x78] sm:$0xff] }
 0x8c3   : > { %2131 = vmatmul.msk.f32.gmra.mxu1 %vm644_vm3, %v1503_v60  ;;  %v1747_v60 = vld [vmem:[%s3486_s10 + $0xe8] sm:$0xff]  ;;  %1778 = vmatpush.msra.mxu2 %v1748_v51 }
 0x8c4   : > { %1754 = vmatpush.msra.mxu1 %v1733_v53 }
 0x8c5   : > { %1779 = vmatpush.msra.mxu2 %v1747_v60 }
 0x8c6   : > { %1755 = vmatpush.msra.mxu1 %v1732_v59 }
 0x938   : > { %v1527_v55 = vpop.f32.mrf.mxu1 }
 0x939   : > { %2136 = vmatmul.msk.f32.vlgmr.msrb.gmra.mxu2 %vm601_vm0, %v1527_v55  ;;  %v1731_v55 = vld [vmem:[%s3486_s10 + $0x68] sm:$0xff] }
 0x93a   : > { %1756 = vmatpush.msra.mxu1 %v1731_v55 }
 0x940   : > { %v1530_v56 = vpop.f32.mrf.mxu1 }
 0x941   : > { %2137 = vmatmul.msk.f32.gmra.mxu2 %vm601_vm0, %v1530_v56  ;;  %vm1582_vm0 = vweird.f32 %v2226_v3 }
 0x9bc   : > { %v1561_v61 = vpop.f32.mrf.mxu2 }
 0x9bd   : > { %v1567_v63 = vadd.f32 %v1561_v61, %v3139_v58  ;;  %v1661_v58 = vld [vmem:[%s3484_s8 + $0xf8] sm:$0xff]  ;;  %v1746_v61 = vld [vmem:[%s3486_s10 + $0xe0] sm:$0xff] }
 0x9be   : > { %1691 = vmatpush.msra.mxu0 %v1661_v58  ;;  %1780 = vmatpush.msra.mxu2 %v1746_v61  ;;  %v1743_v58 = vld [vmem:[%s3486_s10 + $0xc8] sm:$0xff] }
 0x9bf   : > { %v1569_v0 = vadd.f32 %v3099_v11, %v1567_v63  ;;  %v1658_v11 = vld [vmem:[%s3484_s8 + $0xe0] sm:$0xff] }
 0x9c0   : > { %1669 = vmatpush.msra.mxu3 %v1658_v11  ;;  %v1730_v63 = vld [vmem:[%s3486_s10 + $0x60] sm:$0xff] }
 0x9c1   : > { %1573 = vadd.xlane.f32.xlu1 %v1569_v0  ;;  %1757 = vmatpush.msra.mxu1 %v1730_v63  ;;  %v2190_v63 = vld [vmem:[%s3487_s11] ss:$0 sm:$0xff] }
 0x9c2   : > { %1670 = vmatpush.msra.mxu3 %v1656_v19  ;;  %v1740_v19 = vld [vmem:[%s3486_s10 + $0xb0] sm:$0xff] }
 0x9c3   : > { %1758 = vmatpush.msra.mxu1 %v1729_v1 }
 0x9c4   : > { %v1564_v8 = vpop.f32.mrf.mxu2  ;;  %1671 = vmatpush.msra.mxu3 %v1654_v21 }
 0x9c5   : > { %v1568_v57 = vadd.f32 %v1564_v8, %v3155_v62  ;;  %v1579_v62 = vsub.f32 1.0, %v1578_v4  ;;  %1759 = vmatpush.msra.mxu1 %v1728_v33 }
 0x9c6   : > { %1672 = vmatpush.msra.mxu3 %v1652_v23 }
 0x9c7   : > { %v1570_v31 = vadd.f32 %v3103_v13, %v1568_v57  ;;  %v1659_v13 = vld [vmem:[%s3484_s8 + $0xe8] sm:$0xff]  ;;  %v1580_v5 = vmul.f32 %v2226_v3, %v1579_v62  ;;  %v1745_v57 = vld [vmem:[%s3486_s10 + $0xd8] sm:$0xff]  ;;  %v1742_v62 = vld [vmem:[%s3486_s10 + $0xc0] sm:$0xff] }
 0x9c8   : > { %1692 = vmatpush.msra.mxu0 %v1659_v13  ;;  %1673 = vmatpush.msra.mxu3 %v1650_v24  ;;  %v1727_v13 = vld [vmem:[%s3486_s10 + $0x48] sm:$0xff] }
 0x9c9   : > { %1575 = vadd.xlane.f32.xlu2 %v1570_v31  ;;  %v1581_v6 = vadd.f32 %v2226_v3, %v1580_v5  ;;  %1781 = vmatpush.msra.mxu2 %v1745_v57  ;;  %v1739_v24 = vld [vmem:[%s3486_s10 + $0xa8] sm:$0xff] }
 0x9ca   : > { %1693 = vmatpush.msra.mxu0 %v1657_v20  ;;  %1674 = vmatpush.msra.mxu3 %v1648_v26 }
 0x9cb   : > { %v3226_v7 = vsel %vm1582_vm0, %v2226_v3, %v1581_v6  ;;  %v1744_v3 = vld [vmem:[%s3486_s10 + $0xd0] sm:$0xff]  ;;  %v1726_v6 = vld [vmem:[%s3486_s10 + $0x40] sm:$0xff]  ;;  %1760 = vmatpush.msra.mxu1 %v1727_v13 }
 0x9cc   : > { %1694 = vmatpush.msra.mxu0 %v1655_v22  ;;  %1675 = vmatpush.msra.mxu3 %v1646_v28  ;;  %v1724_v22 = vld [vmem:[%s3486_s10 + $0x30] sm:$0xff] }
 0x9cd   : > { %1782 = vmatpush.msra.mxu2 %v1744_v3  ;;  %1761 = vmatpush.msra.mxu1 %v1726_v6 }
 0x9ce   : > { %1695 = vmatpush.msra.mxu0 %v1653_v54  ;;  %1676 = vmatpush.msra.mxu3 %v1644_v30  ;;  %v2189_v54 = vld [vmem:[%s3483_s7] ss:$0 sm:$0xff] }
 0x9cf   : > { %1783 = vmatpush.msra.mxu2 %v1743_v58 }
 0x9d0   : > { %1696 = vmatpush.msra.mxu0 %v1651_v25  ;;  %1677 = vmatpush.msra.mxu3 %v1642_v34 }
 0x9d1   : > { %1784 = vmatpush.msra.mxu2 %v1742_v62 }
 0x9d2   : > { %1697 = vmatpush.msra.mxu0 %v1649_v27  ;;  %1678 = vmatpush.msra.mxu3 %v1640_v36  ;;  %v1738_v27 = vld [vmem:[%s3486_s10 + $0xa0] sm:$0xff] }
 0x9d4   : > { %1698 = vmatpush.msra.mxu0 %v1647_v29  ;;  %1679 = vmatpush.msra.mxu3 %v1638_v38  ;;  %v1737_v29 = vld [vmem:[%s3486_s10 + $0x98] sm:$0xff]  ;;  %v1736_v38 = vld [vmem:[%s3486_s10 + $0x90] sm:$0xff] }
 0x9d6   : > { %1699 = vmatpush.msra.mxu0 %v1645_v32  ;;  %1680 = vmatpush.msra.mxu3 %v1636_v40  ;;  %v1721_v40 = vld [vmem:[%s3486_s10 + $0x18] sm:$0xff] }
 0x9d8   : > { %1700 = vmatpush.msra.mxu0 %v1643_v35  ;;  %1681 = vmatpush.msra.mxu3 %v1634_v42  ;;  %v1720_v42 = vld [vmem:[%s3486_s10 + $0x10] sm:$0xff] }
 0x9da   : > { %1701 = vmatpush.msra.mxu0 %v1641_v37  ;;  %1682 = vmatpush.msra.mxu3 %v1632_v44  ;;  %v1723_v37 = vld [vmem:[%s3486_s10 + $0x28] sm:$0xff]  ;;  %v1718_v44 = vld [vmem:[%s3486_s10] sm:$0xff] }
 0x9dc   : > { %1702 = vmatpush.msra.mxu0 %v1639_v39  ;;  %1683 = vmatpush.msra.mxu3 %v1630_v46  ;;  %v1722_v39 = vld [vmem:[%s3486_s10 + $0x20] sm:$0xff] }
 0x9de   : > { %1703 = vmatpush.msra.mxu0 %v1637_v41  ;;  %v1734_v41 = vld [vmem:[%s3486_s10 + $0x80] sm:$0xff] }
 0x9e0   : > { %1704 = vmatpush.msra.mxu0 %v1635_v43  ;;  %v1719_v43 = vld [vmem:[%s3486_s10 + $0x8] sm:$0xff] }
 0x9e2   : > { %1705 = vmatpush.msra.mxu0 %v1633_v45  ;;  %v1662_v45 = vld [vmem:[%s3485_s9] sm:$0x3] }
 0x9e3   : > { %v1665_v46 = vperm.slane %v1662_v45, 1 }
 0x9e4   : > { %1706 = vmatpush.msra.mxu0 %v1631_v47 }
 0xa34   : > { %v1574_v9 = vpop.xlane.xlu1 %1573 }
 0xa35   : > { %v1584_v10 = vmul.f32 %v3226_v7, %v1574_v9 }
 0xa37   : > { %v3229_v12 = vsub.f32 %v1569_v0, %v1584_v10  ;;  %v1741_v10 = vld [vmem:[%s3486_s10 + $0xb8] sm:$0xff] }
 0xa38   : > { %1785 = vmatpush.msra.mxu2 %v1741_v10 }
 0xa39   : > { %v1588_v14 = vmul.f32 %v3229_v12, %v3229_v12 }
 0xa3a   : > { %1786 = vmatpush.msra.mxu2 %v1740_v19 }
 0xa3b   : > { %1590 = vadd.xlane.f32.xlu0 %v1588_v14 }
 0xa3c   : > { %v1576_v15 = vpop.xlane.xlu2 %1575  ;;  %1787 = vmatpush.msra.mxu2 %v1739_v24 }
 0xa3d   : > { %v1585_v16 = vmul.f32 %v3226_v7, %v1576_v15 }
 0xa3e   : > { %1788 = vmatpush.msra.mxu2 %v1738_v27 }
 0xa3f   : > { %v3234_v17 = vsub.f32 %v1570_v31, %v1585_v16  ;;  %v1725_v16 = vld [vmem:[%s3486_s10 + $0x38] sm:$0xff] }
 0xa40   : > { %1762 = vmatpush.msra.mxu1 %v1725_v16  ;;  %1789 = vmatpush.msra.mxu2 %v1737_v29  ;;  %v2191_v29 = vld [vmem:[%s3488_s12] ss:$0 sm:$0xff] }
 0xa41   : > { %v1589_v18 = vmul.f32 %v3234_v17, %v3234_v17 }
 0xa42   : > { %1763 = vmatpush.msra.mxu1 %v1724_v22  ;;  %1790 = vmatpush.msra.mxu2 %v1736_v38 }
 0xa43   : > { %1592 = vadd.xlane.f32.xlu1 %v1589_v18  ;;  %v2188_v18 = vld [vmem:[%s3482_s6] ss:$0 sm:$0xff] }
 0xa44   : > { %1764 = vmatpush.msra.mxu1 %v1723_v37 }
 0xa46   : > { %1765 = vmatpush.msra.mxu1 %v1722_v39 }
 0xa48   : > { %1766 = vmatpush.msra.mxu1 %v1721_v40 }
 0xa4a   : > { %1767 = vmatpush.msra.mxu1 %v1720_v42 }
 0xa4c   : > { %1768 = vmatpush.msra.mxu1 %v1719_v43 }
 0xa4e   : > { %1769 = vmatpush.msra.mxu1 %v1718_v44 }
 0xaae   : > { %v1591_v48 = vpop.xlane.xlu0 %1590 }
 0xaaf   : > { %v1594_v49 = vmul.f32 %v1591_v48, %v3226_v7 }
 0xab1   : > { %v1596_v50 = vadd.f32 1e-05, %v1594_v49 }
 0xab3   : > { %2227 = vrsqrt.f32 %v1596_v50  ;;  %vm1604_vm9 = vweird.f32 %v1596_v50 }
 0xab6   : > { %v1593_v2 = vpop.xlane.xlu1 %1592 }
 0xab7   : > { %v1595_v56 = vmul.f32 %v1593_v2, %v3226_v7 }
 0xab9   : > { %v2228_v0 = vpop.eup %2227  ;;  %v1597_v8 = vadd.f32 1e-05, %v1595_v56 }
 0xaba   : > { %v1599_v31 = vmul.f32 %v2228_v0, %v1596_v50  ;;  %vm1605_vm3 = vweird.f32 %v2228_v0  ;;  %v1664_v50 = vperm.slane %v1662_v45, 0 }
 0xabb   : > { %2229 = vrsqrt.f32 %v1597_v8  ;;  %vm1606_vm10 = vmor %vm1604_vm9, %vm1605_vm3  ;;  %vm1614_vm12 = vweird.f32 %v1597_v8 }
 0xabc   : > { %v1600_v4 = vmul.f32 %v2228_v0, %v1599_v31 }
 0xabe   : > { %v1601_v11 = vmul.f32 0.5, %v1600_v4 }
 0xac0   : > { %v1602_v5 = vsub.f32 1.5, %v1601_v11 }
 0xac1   : > { %v2230_v9 = vpop.eup %2229 }
 0xac2   : > { %v1603_v14 = vmul.f32 %v2228_v0, %v1602_v5  ;;  %v1609_v15 = vmul.f32 %v2230_v9, %v1597_v8  ;;  %vm1615_vm11 = vweird.f32 %v2230_v9 }
 0xac3   : > { %vm1616_vm13 = vmor %vm1614_vm12, %vm1615_vm11 }
 0xac4   : > { %v1607_v20 = vsel %vm1606_vm10, %v2228_v0, %v1603_v14  ;;  %v1610_v21 = vmul.f32 %v2230_v9, %v1609_v15 }
 0xac5   : > { %v1618_v23 = vmul.f32 %v1607_v20, %v3229_v12 }
 0xac6   : > { %v1611_v25 = vmul.f32 0.5, %v1610_v21 }
 0xac7   : > { %v1623_v26 = vmul.f32 %v2188_v18, %v1618_v23 }
 0xac8   : > { %v1612_v28 = vsub.f32 1.5, %v1611_v25 }
 0xac9   : > { %v1628_v12 = vadd.f32 %v2189_v54, %v1623_v26 }
 0xaca   : > { %v1613_v30 = vmul.f32 %v2230_v9, %v1612_v28 }
 0xacb   : > { %1684 = vmatmul.f32.vlgmr.msra.gmra.mxu3 %v1628_v12  ;;  %1707 = vmatmul.f32.vlgmr.msra.gmra.mxu0 %v1628_v12 }
 0xacc   : > { %v1617_v32 = vsel %vm1616_vm13, %v2230_v9, %v1613_v30 }
 0xacd   : > { %v1619_v34 = vmul.f32 %v1617_v32, %v3234_v17  ;;  %v1735_v17 = vld [vmem:[%s3486_s10 + $0x88] sm:$0xff] }
 0xace   : > { %1791 = vmatpush.msra.mxu2 %v1735_v17 }
 0xacf   : > { %v1624_v35 = vmul.f32 %v2188_v18, %v1619_v34  ;;  %v2192_v34 = vld [vmem:[%s3489_s13] ss:$0 sm:$0xff] }
 0xad0   : > { %1792 = vmatpush.msra.mxu2 %v1734_v41 }
 0xad1   : > { %v1629_v36 = vadd.f32 %v2189_v54, %v1624_v35 }
 0xad3   : > { %1687 = vmatmul.f32.gmra.mxu3 %v1629_v36  ;;  %1710 = vmatmul.f32.gmra.mxu0 %v1629_v36 }
 0xb48   : > { %v1708_v47 = vpop.f32.mrf.mxu0 }
 0xb49   : > { %v1709_v48 = vadd.f32 %v1708_v47, %v1665_v46 }
 0xb4b   : > { %v1715_v49 = vmax.f32 %v1709_v48, 0.0 }
 0xb4d   : > { %1793 = vmatmul.f32.vlgmr.msra.gmra.mxu2 %v1715_v49 }
 0xb4e   : > { %v1685_v52 = vpop.f32.mrf.mxu3 }
 0xb4f   : > { %v1686_v51 = vadd.f32 %v1685_v52, %v1664_v50 }
 0xb50   : > { %v1711_v53 = vpop.f32.mrf.mxu0 }
 0xb51   : > { %v1714_v59 = vmax.f32 %v1686_v51, 0.0  ;;  %v1712_v60 = vadd.f32 %v1711_v53, %v1665_v46 }
 0xb53   : > { %v1717_v2 = vmax.f32 %v1712_v60, 0.0  ;;  %1770 = vmatmul.f32.vlgmr.msra.gmra.mxu1 %v1714_v59 }
 0xb55   : > { %1796 = vmatmul.f32.gmra.mxu2 %v1717_v2 }
 0xb56   : > { %v1688_v55 = vpop.f32.mrf.mxu3 }
 0xb57   : > { %v1689_v56 = vadd.f32 %v1688_v55, %v1664_v50 }
 0xb59   : > { %v1716_v61 = vmax.f32 %v1689_v56, 0.0 }
 0xb5b   : > { %1773 = vmatmul.f32.gmra.mxu1 %v1716_v61 }
 0xbd0   : > { %v1771_v0 = vpop.f32.mrf.mxu1  ;;  %v1794_v8 = vpop.f32.mrf.mxu2 }
 0xbd1   : > { %v1772_v57 = vadd.f32 %v2190_v63, %v1771_v0 }
 0xbd3   : > { %v1795_v31 = vadd.f32 %v1794_v8, %v1772_v57 }
 0xbd5   : > { %v1800_v1 = vadd.f32 %v1795_v31, %v1628_v12 }
 0xbd7   : > { %1804 = vadd.xlane.f32.xlu2 %v1800_v1 }
 0xbd8   : > { %v1774_v3 = vpop.f32.mrf.mxu1  ;;  %v1797_v33 = vpop.f32.mrf.mxu2 }
 0xbd9   : > { %v1775_v4 = vadd.f32 %v2190_v63, %v1774_v3 }
 0xbdb   : > { %v1798_v58 = vadd.f32 %v1797_v33, %v1775_v4 }
 0xbdd   : > { %v1801_v11 = vadd.f32 %v1798_v58, %v1629_v36 }
 0xbdf   : > { %1806 = vadd.xlane.f32.xlu0 %v1801_v11 }
 0xc4a   : > { %v1805_v13 = vpop.xlane.xlu2 %1804 }
 0xc4b   : > { %v1808_v62 = vmul.f32 %v1805_v13, %v3226_v7 }
 0xc4d   : > { %v1810_v5 = vsub.f32 %v1800_v1, %v1808_v62 }
 0xc4f   : > { %v1812_v6 = vmul.f32 %v1810_v5, %v1810_v5 }
 0xc51   : > { %1814 = vadd.xlane.f32.xlu1 %v1812_v6 }
 0xc52   : > { %v1807_v9 = vpop.xlane.xlu0 %1806 }
 0xc53   : > { %v1809_v10 = vmul.f32 %v1807_v9, %v3226_v7 }
 0xc55   : > { %v1811_v14 = vsub.f32 %v1801_v11, %v1809_v10 }
 0xc57   : > { %v1813_v15 = vmul.f32 %v1811_v14, %v1811_v14 }
 0xc59   : > { %1816 = vadd.xlane.f32.xlu2 %v1813_v15 }
 0xcc4   : > { %v1815_v16 = vpop.xlane.xlu1 %1814 }
 0xcc5   : > { %v1818_v18 = vmul.f32 %v1815_v16, %v3226_v7 }
 0xcc7   : > { %v1820_v19 = vadd.f32 1e-05, %v1818_v18 }
 0xcc9   : > { %2231 = vrsqrt.f32 %v1820_v19  ;;  %vm1828_vm2 = vweird.f32 %v1820_v19 }
 0xccc   : > { %v1817_v20 = vpop.xlane.xlu2 %1816 }
 0xccd   : > { %v1819_v21 = vmul.f32 %v1817_v20, %v3226_v7 }
 0xccf   : > { %v2232_v22 = vpop.eup %2231  ;;  %v1821_v23 = vadd.f32 1e-05, %v1819_v21 }
 0xcd0   : > { %v1823_v54 = vmul.f32 %v2232_v22, %v1820_v19  ;;  %vm1829_vm14 = vweird.f32 %v2232_v22 }
 0xcd1   : > { %2233 = vrsqrt.f32 %v1821_v23  ;;  %vm1830_vm15 = vmor %vm1828_vm2, %vm1829_vm14  ;;  %vm1838_vm4 = vweird.f32 %v1821_v23 }
 0xcd2   : > { %v1824_v24 = vmul.f32 %v2232_v22, %v1823_v54 }
 0xcd4   : > { %v1825_v25 = vmul.f32 0.5, %v1824_v24 }
 0xcd6   : > { %v1826_v26 = vsub.f32 1.5, %v1825_v25 }
 0xcd7   : > { %v2234_v27 = vpop.eup %2233 }
 0xcd8   : > { %v1827_v28 = vmul.f32 %v2232_v22, %v1826_v26  ;;  %v1833_v12 = vmul.f32 %v2234_v27, %v1821_v23  ;;  %vm1839_vm1 = vweird.f32 %v2234_v27 }
 0xcd9   : > { %vm1840_vm5 = vmor %vm1838_vm4, %vm1839_vm1 }
 0xcda   : > { %v1831_v7 = vsel %vm1830_vm15, %v2232_v22, %v1827_v28  ;;  %v1834_v30 = vmul.f32 %v2234_v27, %v1833_v12 }
 0xcdb   : > { %v1842_v32 = vmul.f32 %v1831_v7, %v1810_v5 }
 0xcdc   : > { %v1835_v35 = vmul.f32 0.5, %v1834_v30 }
 0xcdd   : > { %v1847_v36 = vmul.f32 %v2191_v29, %v1842_v32 }
 0xcde   : > { %v1836_v37 = vsub.f32 1.5, %v1835_v35 }
 0xcdf   : > { %v1852_v38 = vadd.f32 %v2192_v34, %v1847_v36 }
 0xce0   : > { %v1837_v39 = vmul.f32 %v2234_v27, %v1836_v37 }
 0xce1   : > { %1854 = vst [vmem:[%s471_s28] sm:$0xff] %v1852_v38 }
 0xce2   : > { %v1841_v17 = vsel %vm1840_vm5, %v2234_v27, %v1837_v39 }
 0xce3   : > { %v1843_v40 = vmul.f32 %v1841_v17, %v1811_v14 }
 0xce5   : > { %v1848_v41 = vmul.f32 %v2191_v29, %v1843_v40 }
 0xce7   : > { %v1853_v42 = vadd.f32 %v2192_v34, %v1848_v41 }
 0xce9   : > { %1855 = vst [vmem:[%s471_s28 + $0x8] sm:$0xff] %v1853_v42 }
 0xcea   : > { %2264 = shalt.err (!%p2261_p3)
}
 0xceb   : > { %s2303_s20 = smov 128   ;;  %s2304_s27 = smov 8  }
 0xcec   : > { %2145 = dma.vmem_to_hbm [thread:$0]  (%p2418_p5), %s1870_s25, 256, %s1872_s18, %s1857_s17, %s2303_s20, %s2303_s20, %s2304_s27  }
 0xced PF: > { %s3509_s24 = sld [smem:[#allocation7_spill]] }
 0xcee   : > { %s3510_s28 = sld [smem:[#allocation5_spill]] }
 0xcf3   : > { %p2151_p4 = scmp.ge.s32.totalorder %s3509_s24, 2 }
 0xcf4   : > { %s1886_s29 = sand.u32 1, %s3510_s28  }
 0xcf5   : > { %p2148_p7 = pnand %p2151_p4, %p2422_p6  ;;  %s1887_s16 = scalar_lea.sflag [#allocation3], %s1886_s29 }
 0xcf7   : > { %p2149_p8 = pneg %p2148_p7 }
 0xcf9   : > { %2282 = dma.done.wait (%p2149_p8), %s1887_s16, 256  }
 0xcfa   : > { %2284 = vsyncadd (%p2149_p8), %s1887_s16, 4294967040  ;;  %s3512_s16 = sld [smem:[#allocation8_spill]]  ;;  %s3515_s29 = smov %s2291_s30 }
 0xcfb   : > { %s3513_s26 = sld [smem:[#allocation6_spill]] }
 0xcfc   : > { %s3514_s15 = sld [smem:[#allocation9_spill]] }
 0xd00   : > { %p24_p9 = scmp.ge.s32.totalorder %s3512_s16, 4  }
 0xd01   : > { %s3516_s30 = smov %s3513_s26 }
 0xd02   :  { %26 = sbr.rel (!%p24_p9) target bundleno = 5 (0x5), region = 126 }
 0xd07   :  { %1893 = vsyncpa [#allocation3], 1 }
 0xd08   :  { %1895 = vsyncpa [#allocation3 + $0x1], 1 }

</bundles_post_ra>
